<compile_context>
chip_gen: v7x
topology: tpu7x:2x2x1
jax: 0.10.0
libtpu: 0.0.40
codegen_flags: <defaults>
</compile_context>

<pallas_src>
import functools

import jax
import jax.numpy as jnp
from jax import lax
from jax.experimental import pallas as pl
from jax.experimental.pallas import tpu as pltpu


def _softplus(x):
    # torch.nn.Softplus (beta=1): log(1 + exp(x)).  Stable form that keeps the
    # EUP work (exp, log1p) minimal and avoids jnp.logaddexp's extra inf/nan
    # select handling on the VPU.
    return jnp.maximum(x, 0.0) + jnp.log1p(jnp.exp(-jnp.abs(x)))


def _nn_kernel(x_ref, w0l_ref, w00_ref, b0_ref, *refs, nlayers, nphi, block_b):
    """One batch tile of gam = Nphi * (omega([l, m*p]) - omega([0, m*p])).

    x_ref   : (block_b, Nphi+1) raw input tile (un-transposed, un-scaled)
    w0l_ref : (Nnode, Nphi+1)  layer-0 weight, m folded into p-columns, l kept
    w00_ref : (Nnode, Nphi+1)  same but l-column zeroed  (l=0 branch)
    b0_ref  : (Nnode, 1)
    refs    : w1, b1, ..., w_{L-2}, b_{L-2}, w_last, out_ref
    out_ref : (1, block_b) lane-dense output row
    """
    out_ref = refs[-1]
    wlast_ref = refs[-2]
    hid = refs[:-2]                                  # 2*(nlayers-2) refs

    x = x_ref[...]                                   # (block_b, Nphi+1) f32
    b0 = b0_ref[...]                                 # (Nnode, 1), lane-broadcast

    # Contract the feature axes directly: (out,in) x (batch,in) -> (out,batch).
    dn = (((1,), (1,)), ((), ()))
    z_l = lax.dot_general(w0l_ref[...], x, dn,
                          preferred_element_type=jnp.float32) + b0
    z_0 = lax.dot_general(w00_ref[...], x, dn,
                          preferred_element_type=jnp.float32) + b0

    # Stack the two branches along lanes -> one dense pass per hidden layer.
    h = jnp.concatenate([z_l, z_0], axis=1)          # (Nnode, 2*block_b)

    for li in range(nlayers - 2):                    # hidden Linears 1..L-2
        w = hid[2 * li][...]                         # (Nnode, Nnode)
        b = hid[2 * li + 1][...]                     # (Nnode, 1)
        h = _softplus(h)
        h = jnp.dot(w, h, preferred_element_type=jnp.float32) + b

    # Last layer on the branch difference (the bias cancels exactly); keep the
    # cancellation-sensitive subtraction in f32 before the contraction.
    h = _softplus(h)                                 # (Nnode, 2*block_b)
    d = h[:, :block_b] - h[:, block_b:]              # (Nnode, block_b)
    gam = float(nphi) * jnp.dot(wlast_ref[...], d,
                                preferred_element_type=jnp.float32)
    out_ref[...] = gam.astype(out_ref.dtype)         # (1, block_b)


def init_params(key, nphi, nnode, nlayer=4, std=0.001, use_xavier=1):
    """Mirrors NN._init_weights.

    Layer structure (Nlayer=4 -> 5 Linear layers):
      Linear(Nphi+1, Nnode), (Nlayer-1) x Linear(Nnode, Nnode), Linear(Nnode, 1)
    Weights are kept in PyTorch (out, in) layout; biases as (out, 1) columns.
    xavier_normal_(gain=std) => std_eff = std * sqrt(2/(fan_in+fan_out)).
    """
    layer_dims = [(nphi + 1, nnode)]
    layer_dims += [(nnode, nnode)] * (nlayer - 1)
    layer_dims.append((nnode, 1))

    params = []
    keys = jax.random.split(key, len(layer_dims))
    for k, (fan_in, fan_out) in zip(keys, layer_dims):
        if use_xavier == 1:
            w_std = std * (2.0 / (fan_in + fan_out)) ** 0.5
        else:
            w_std = std
        w = w_std * jax.random.normal(k, (fan_out, fan_in), dtype=jnp.float32)
        b = jnp.zeros((fan_out, 1), dtype=jnp.float32)
        params.append((w, b))
    return params


def _round_up(v, mult):
    return ((v + mult - 1) // mult) * mult


def nn_forward(x, params, nphi, m2, *, block_b=None):
    """Reproduces NN.forward: x is (B, Nphi+1) = [l, p1..pNphi] -> (B, 1)."""
    B, nin = x.shape
    assert nin == nphi + 1
    nlayers = len(params)
    m = float(m2) ** 0.5

    if block_b is None:
        # Large tiles amortize the ~0.35us per-grid-step overhead (per-tile
        # work here is tiny).  Keep an even number (>=2) of tiles so v7x's two
        # TensorCores both get work; multiple of 128 lanes always.
        cap = 2048
        if B <= 128:
            block_b = 128
        else:
            n_t = max(2, pl.cdiv(B, cap))
            n_t += n_t % 2
            block_b = _round_up(pl.cdiv(B, n_t), 128)
    if block_b % 128 != 0:
        raise ValueError("block_b must be a multiple of 128")

    n_tiles = pl.cdiv(B, block_b)   # partial last tile handled by Pallas

    # Fold m into layer-0's p-columns; build the l=0 variant by zeroing the
    # l-column.  Tiny precompute (Nnode x (Nphi+1)).
    w0, b0 = params[0]
    w0l = jnp.concatenate([w0[:, :1], m * w0[:, 1:]], axis=1)
    w00 = jnp.concatenate([jnp.zeros_like(w0[:, :1]), m * w0[:, 1:]], axis=1)

    flat = [w0l, w00, b0]
    wb_specs = [pl.BlockSpec(w0l.shape, lambda i: (0, 0)),
                pl.BlockSpec(w00.shape, lambda i: (0, 0)),
                pl.BlockSpec(b0.shape, lambda i: (0, 0))]
    for w, b in params[1:-1]:
        flat.extend([w, b])
        wb_specs.append(pl.BlockSpec(w.shape, lambda i: (0, 0)))
        wb_specs.append(pl.BlockSpec(b.shape, lambda i: (0, 0)))
    w_last, _b_last = params[-1]     # last bias cancels in the branch diff
    flat.append(w_last)
    wb_specs.append(pl.BlockSpec(w_last.shape, lambda i: (0, 0)))

    kernel = functools.partial(_nn_kernel, nlayers=nlayers, nphi=nphi,
                               block_b=block_b)

    out = pl.pallas_call(
        kernel,
        out_shape=jax.ShapeDtypeStruct((1, B), jnp.float32),
        grid_spec=pltpu.PrefetchScalarGridSpec(
            num_scalar_prefetch=0,
            grid=(n_tiles,),
            in_specs=[pl.BlockSpec((block_b, nphi + 1), lambda i: (i, 0))]
                     + wb_specs,
            out_specs=pl.BlockSpec((1, block_b), lambda i: (0, i)),
        ),
        compiler_params=pltpu.CompilerParams(
            dimension_semantics=("parallel",),      # megacore sharding on v7x
            vmem_limit_bytes=48 * 1024 * 1024,      # headroom for big tiles
        ),
    )(x, *flat)

    # Lane-dense (1, B) row -> module's (B, 1) column (contiguous, near-free).
    return out[0, :].reshape(B, 1)


def reference_forward(x, params, nphi, m2):
    """Pure-JAX reference for correctness checking (matches the torch module)."""
    m = m2 ** 0.5
    lsv = x[:, 0:1]
    pstil = m * x[:, 1:]
    lx_p = jnp.concatenate((lsv, pstil), axis=1)
    l0x_p = jnp.concatenate((0.0 * lsv, pstil), axis=1)

    def omega(h):
        for li, (w, b) in enumerate(params):
            h = h @ w.T + b[:, 0]
            if li != len(params) - 1:
                h = jnp.logaddexp(h, 0.0)
        return h

    return float(nphi) * (omega(lx_p) - omega(l0x_p))


if __name__ == "__main__":
    # Small shapes consistent with the module: Nphi=4, Nnode=32, Nlayer=4.
    # B=256 exercises the batch grid (2 tiles of 128); std=0.5 keeps outputs
    # O(1) so the correctness check is meaningful.
    Nphi, Nnode, Nlayer = 4, 32, 4
    m2 = 1.5

    key = jax.random.PRNGKey(0)
    k_x, k_p = jax.random.split(key)
    params = init_params(k_p, Nphi, Nnode, nlayer=Nlayer, std=0.5, use_xavier=1)

    # Aligned batch (2 full tiles).
    B = 256
    x = jax.random.normal(k_x, (B, Nphi + 1), dtype=jnp.float32)
    gam = jax.block_until_ready(nn_forward(x, params, Nphi, m2))
    ref = reference_forward(x, params, Nphi, m2)
    assert gam.shape == (B, 1), gam.shape
    assert jnp.allclose(gam, ref, atol=1e-5, rtol=1e-5), (
        float(jnp.max(jnp.abs(gam - ref))))

    # Ragged batch (partial last tile, no wrapper-side padding).
    B2 = 192
    x2 = x[:B2]
    gam2 = jax.block_until_ready(nn_forward(x2, params, Nphi, m2))
    ref2 = reference_forward(x2, params, Nphi, m2)
    assert gam2.shape == (B2, 1), gam2.shape
    assert jnp.allclose(gam2, ref2, atol=1e-5, rtol=1e-5), (
        float(jnp.max(jnp.abs(gam2 - ref2))))

    print("KERNEL_OK")
</pallas_src>

<mosaic_0001>
module attributes {stable_mosaic.version = 11 : i64} {
  func.func @_nn_kernel(%arg0: i32, %arg1: memref<128x5xf32, #tpu.memory_space<vmem>>, %arg2: memref<32x5xf32, #tpu.memory_space<vmem>>, %arg3: memref<32x5xf32, #tpu.memory_space<vmem>>, %arg4: memref<32x1xf32, #tpu.memory_space<vmem>>, %arg5: memref<32x32xf32, #tpu.memory_space<vmem>>, %arg6: memref<32x1xf32, #tpu.memory_space<vmem>>, %arg7: memref<32x32xf32, #tpu.memory_space<vmem>>, %arg8: memref<32x1xf32, #tpu.memory_space<vmem>>, %arg9: memref<32x32xf32, #tpu.memory_space<vmem>>, %arg10: memref<32x1xf32, #tpu.memory_space<vmem>>, %arg11: memref<1x32xf32, #tpu.memory_space<vmem>>, %arg12: memref<1x128xf32, #tpu.memory_space<vmem>>) attributes {dimension_semantics = [#tpu.dimension_semantics<parallel>], iteration_bounds = array<i64: 2>, scalar_prefetch = 0 : i64, scratch_operands = 0 : i64, tpu.core_type = #tpu.core_type<tc>, window_params = [{transform_indices = @transform_0, window_bounds = array<i64: 128, 5>}, {pipeline_mode = #tpu.pipeline_mode<synchronous>, transform_indices = @transform_1, window_bounds = array<i64: 32, 5>}, {pipeline_mode = #tpu.pipeline_mode<synchronous>, transform_indices = @transform_2, window_bounds = array<i64: 32, 5>}, {pipeline_mode = #tpu.pipeline_mode<synchronous>, transform_indices = @transform_3, window_bounds = array<i64: 32, 1>}, {pipeline_mode = #tpu.pipeline_mode<synchronous>, transform_indices = @transform_4, window_bounds = array<i64: 32, 32>}, {pipeline_mode = #tpu.pipeline_mode<synchronous>, transform_indices = @transform_5, window_bounds = array<i64: 32, 1>}, {pipeline_mode = #tpu.pipeline_mode<synchronous>, transform_indices = @transform_6, window_bounds = array<i64: 32, 32>}, {pipeline_mode = #tpu.pipeline_mode<synchronous>, transform_indices = @transform_7, window_bounds = array<i64: 32, 1>}, {pipeline_mode = #tpu.pipeline_mode<synchronous>, transform_indices = @transform_8, window_bounds = array<i64: 32, 32>}, {pipeline_mode = #tpu.pipeline_mode<synchronous>, transform_indices = @transform_9, window_bounds = array<i64: 32, 1>}, {pipeline_mode = #tpu.pipeline_mode<synchronous>, transform_indices = @transform_10, window_bounds = array<i64: 1, 32>}, {transform_indices = @transform_11, window_bounds = array<i64: 1, 128>}]} {
    %c0 = arith.constant 0 : index
    %c0_0 = arith.constant 0 : index
    %0 = vector.load %arg1[%c0, %c0_0] : memref<128x5xf32, #tpu.memory_space<vmem>>, vector<128x5xf32>
    %c0_1 = arith.constant 0 : index
    %c0_2 = arith.constant 0 : index
    %1 = vector.load %arg4[%c0_1, %c0_2] : memref<32x1xf32, #tpu.memory_space<vmem>>, vector<32x1xf32>
    %c0_3 = arith.constant 0 : index
    %c0_4 = arith.constant 0 : index
    %2 = vector.load %arg2[%c0_3, %c0_4] : memref<32x5xf32, #tpu.memory_space<vmem>>, vector<32x5xf32>
    %cst = arith.constant dense<0.000000e+00> : vector<32x128xf32>
    %3 = tpu.matmul %2, %0, %cst {dimension_numbers = #tpu.dot_dimension_numbers<[1], [1], [0], [0], [0, 0, 1, 0], [], []>} : vector<32x5xf32>, vector<128x5xf32>, vector<32x128xf32> -> vector<32x128xf32>
    %4 = vector.broadcast %1 : vector<32x1xf32> to vector<32x128xf32>
    %5 = arith.addf %3, %4 : vector<32x128xf32>
    %c0_5 = arith.constant 0 : index
    %c0_6 = arith.constant 0 : index
    %6 = vector.load %arg3[%c0_5, %c0_6] : memref<32x5xf32, #tpu.memory_space<vmem>>, vector<32x5xf32>
    %cst_7 = arith.constant dense<0.000000e+00> : vector<32x128xf32>
    %7 = tpu.matmul %6, %0, %cst_7 {dimension_numbers = #tpu.dot_dimension_numbers<[1], [1], [0], [0], [0, 0, 1, 0], [], []>} : vector<32x5xf32>, vector<128x5xf32>, vector<32x128xf32> -> vector<32x128xf32>
    %8 = vector.broadcast %1 : vector<32x1xf32> to vector<32x128xf32>
    %9 = arith.addf %7, %8 : vector<32x128xf32>
    %10 = tpu.concatenate %5, %9 in 1 : vector<32x128xf32>, vector<32x128xf32> -> vector<32x256xf32>
    %c0_8 = arith.constant 0 : index
    %c0_9 = arith.constant 0 : index
    %11 = vector.load %arg5[%c0_8, %c0_9] : memref<32x32xf32, #tpu.memory_space<vmem>>, vector<32x32xf32>
    %c0_10 = arith.constant 0 : index
    %c0_11 = arith.constant 0 : index
    %12 = vector.load %arg6[%c0_10, %c0_11] : memref<32x1xf32, #tpu.memory_space<vmem>>, vector<32x1xf32>
    %cst_12 = arith.constant 0.000000e+00 : f32
    %13 = vector.broadcast %cst_12 : f32 to vector<32x256xf32>
    %14 = arith.maximumf %10, %13 : vector<32x256xf32>
    %15 = math.absf %10 : vector<32x256xf32>
    %cst_13 = arith.constant 0.000000e+00 : f32
    %16 = vector.broadcast %cst_13 : f32 to vector<32x256xf32>
    %17 = arith.subf %16, %15 : vector<32x256xf32>
    %18 = math.exp %17 : vector<32x256xf32>
    %19 = math.log1p %18 : vector<32x256xf32>
    %20 = arith.addf %14, %19 : vector<32x256xf32>
    %cst_14 = arith.constant dense<0.000000e+00> : vector<32x256xf32>
    %21 = tpu.matmul %11, %20, %cst_14 {dimension_numbers = #tpu.dot_dimension_numbers<[1], [0], [0], [1], [0, 0, 1, 1], [], []>} : vector<32x32xf32>, vector<32x256xf32>, vector<32x256xf32> -> vector<32x256xf32>
    %22 = vector.broadcast %12 : vector<32x1xf32> to vector<32x256xf32>
    %23 = arith.addf %21, %22 : vector<32x256xf32>
    %c0_15 = arith.constant 0 : index
    %c0_16 = arith.constant 0 : index
    %24 = vector.load %arg7[%c0_15, %c0_16] : memref<32x32xf32, #tpu.memory_space<vmem>>, vector<32x32xf32>
    %c0_17 = arith.constant 0 : index
    %c0_18 = arith.constant 0 : index
    %25 = vector.load %arg8[%c0_17, %c0_18] : memref<32x1xf32, #tpu.memory_space<vmem>>, vector<32x1xf32>
    %cst_19 = arith.constant 0.000000e+00 : f32
    %26 = vector.broadcast %cst_19 : f32 to vector<32x256xf32>
    %27 = arith.maximumf %23, %26 : vector<32x256xf32>
    %28 = math.absf %23 : vector<32x256xf32>
    %cst_20 = arith.constant 0.000000e+00 : f32
    %29 = vector.broadcast %cst_20 : f32 to vector<32x256xf32>
    %30 = arith.subf %29, %28 : vector<32x256xf32>
    %31 = math.exp %30 : vector<32x256xf32>
    %32 = math.log1p %31 : vector<32x256xf32>
    %33 = arith.addf %27, %32 : vector<32x256xf32>
    %cst_21 = arith.constant dense<0.000000e+00> : vector<32x256xf32>
    %34 = tpu.matmul %24, %33, %cst_21 {dimension_numbers = #tpu.dot_dimension_numbers<[1], [0], [0], [1], [0, 0, 1, 1], [], []>} : vector<32x32xf32>, vector<32x256xf32>, vector<32x256xf32> -> vector<32x256xf32>
    %35 = vector.broadcast %25 : vector<32x1xf32> to vector<32x256xf32>
    %36 = arith.addf %34, %35 : vector<32x256xf32>
    %c0_22 = arith.constant 0 : index
    %c0_23 = arith.constant 0 : index
    %37 = vector.load %arg9[%c0_22, %c0_23] : memref<32x32xf32, #tpu.memory_space<vmem>>, vector<32x32xf32>
    %c0_24 = arith.constant 0 : index
    %c0_25 = arith.constant 0 : index
    %38 = vector.load %arg10[%c0_24, %c0_25] : memref<32x1xf32, #tpu.memory_space<vmem>>, vector<32x1xf32>
    %cst_26 = arith.constant 0.000000e+00 : f32
    %39 = vector.broadcast %cst_26 : f32 to vector<32x256xf32>
    %40 = arith.maximumf %36, %39 : vector<32x256xf32>
    %41 = math.absf %36 : vector<32x256xf32>
    %cst_27 = arith.constant 0.000000e+00 : f32
    %42 = vector.broadcast %cst_27 : f32 to vector<32x256xf32>
    %43 = arith.subf %42, %41 : vector<32x256xf32>
    %44 = math.exp %43 : vector<32x256xf32>
    %45 = math.log1p %44 : vector<32x256xf32>
    %46 = arith.addf %40, %45 : vector<32x256xf32>
    %cst_28 = arith.constant dense<0.000000e+00> : vector<32x256xf32>
    %47 = tpu.matmul %37, %46, %cst_28 {dimension_numbers = #tpu.dot_dimension_numbers<[1], [0], [0], [1], [0, 0, 1, 1], [], []>} : vector<32x32xf32>, vector<32x256xf32>, vector<32x256xf32> -> vector<32x256xf32>
    %48 = vector.broadcast %38 : vector<32x1xf32> to vector<32x256xf32>
    %49 = arith.addf %47, %48 : vector<32x256xf32>
    %cst_29 = arith.constant 0.000000e+00 : f32
    %50 = vector.broadcast %cst_29 : f32 to vector<32x256xf32>
    %51 = arith.maximumf %49, %50 : vector<32x256xf32>
    %52 = math.absf %49 : vector<32x256xf32>
    %cst_30 = arith.constant 0.000000e+00 : f32
    %53 = vector.broadcast %cst_30 : f32 to vector<32x256xf32>
    %54 = arith.subf %53, %52 : vector<32x256xf32>
    %55 = math.exp %54 : vector<32x256xf32>
    %56 = math.log1p %55 : vector<32x256xf32>
    %57 = arith.addf %51, %56 : vector<32x256xf32>
    %58 = vector.extract_strided_slice %57 {offsets = [0, 0], sizes = [32, 128], strides = [1, 1]} : vector<32x256xf32> to vector<32x128xf32>
    %59 = vector.extract_strided_slice %57 {offsets = [0, 128], sizes = [32, 128], strides = [1, 1]} : vector<32x256xf32> to vector<32x128xf32>
    %60 = arith.subf %58, %59 : vector<32x128xf32>
    %c0_31 = arith.constant 0 : index
    %c0_32 = arith.constant 0 : index
    %61 = vector.load %arg11[%c0_31, %c0_32] : memref<1x32xf32, #tpu.memory_space<vmem>>, vector<1x32xf32>
    %cst_33 = arith.constant dense<0.000000e+00> : vector<1x128xf32>
    %62 = tpu.matmul %61, %60, %cst_33 {dimension_numbers = #tpu.dot_dimension_numbers<[1], [0], [0], [1], [0, 0, 1, 1], [], []>} : vector<1x32xf32>, vector<32x128xf32>, vector<1x128xf32> -> vector<1x128xf32>
    %cst_34 = arith.constant 4.000000e+00 : f32
    %63 = vector.broadcast %cst_34 : f32 to vector<1x128xf32>
    %64 = arith.mulf %63, %62 : vector<1x128xf32>
    %c0_35 = arith.constant 0 : index
    %c0_36 = arith.constant 0 : index
    %65 = vector.load %arg12[%c0_35, %c0_36] : memref<1x128xf32, #tpu.memory_space<vmem>>, vector<1x128xf32>
    tpu.vector_store %arg12[%c0_35, %c0_36], %64 {strides = array<i32>} : memref<1x128xf32, #tpu.memory_space<vmem>>, vector<1x128xf32>,
    return
  }
  func.func @transform_0(%arg0: i32) -> (i32, i32) {
    %c0_i32 = arith.constant 0 : i32
    %c0_i32_0 = arith.constant 0 : i32
    return %arg0, %c0_i32 : i32, i32
  }
  func.func @transform_1(%arg0: i32) -> (i32, i32) {
    %c0_i32 = arith.constant 0 : i32
    %c0_i32_0 = arith.constant 0 : i32
    %c0_i32_1 = arith.constant 0 : i32
    return %c0_i32, %c0_i32_0 : i32, i32
  }
  func.func @transform_2(%arg0: i32) -> (i32, i32) {
    %c0_i32 = arith.constant 0 : i32
    %c0_i32_0 = arith.constant 0 : i32
    %c0_i32_1 = arith.constant 0 : i32
    return %c0_i32, %c0_i32_0 : i32, i32
  }
  func.func @transform_3(%arg0: i32) -> (i32, i32) {
    %c0_i32 = arith.constant 0 : i32
    %c0_i32_0 = arith.constant 0 : i32
    %c0_i32_1 = arith.constant 0 : i32
    return %c0_i32, %c0_i32_0 : i32, i32
  }
  func.func @transform_4(%arg0: i32) -> (i32, i32) {
    %c0_i32 = arith.constant 0 : i32
    %c0_i32_0 = arith.constant 0 : i32
    %c0_i32_1 = arith.constant 0 : i32
    return %c0_i32, %c0_i32_0 : i32, i32
  }
  func.func @transform_5(%arg0: i32) -> (i32, i32) {
    %c0_i32 = arith.constant 0 : i32
    %c0_i32_0 = arith.constant 0 : i32
    %c0_i32_1 = arith.constant 0 : i32
    return %c0_i32, %c0_i32_0 : i32, i32
  }
  func.func @transform_6(%arg0: i32) -> (i32, i32) {
    %c0_i32 = arith.constant 0 : i32
    %c0_i32_0 = arith.constant 0 : i32
    %c0_i32_1 = arith.constant 0 : i32
    return %c0_i32, %c0_i32_0 : i32, i32
  }
  func.func @transform_7(%arg0: i32) -> (i32, i32) {
    %c0_i32 = arith.constant 0 : i32
    %c0_i32_0 = arith.constant 0 : i32
    %c0_i32_1 = arith.constant 0 : i32
    return %c0_i32, %c0_i32_0 : i32, i32
  }
  func.func @transform_8(%arg0: i32) -> (i32, i32) {
    %c0_i32 = arith.constant 0 : i32
    %c0_i32_0 = arith.constant 0 : i32
    %c0_i32_1 = arith.constant 0 : i32
    return %c0_i32, %c0_i32_0 : i32, i32
  }
  func.func @transform_9(%arg0: i32) -> (i32, i32) {
    %c0_i32 = arith.constant 0 : i32
    %c0_i32_0 = arith.constant 0 : i32
    %c0_i32_1 = arith.constant 0 : i32
    return %c0_i32, %c0_i32_0 : i32, i32
  }
  func.func @transform_10(%arg0: i32) -> (i32, i32) {
    %c0_i32 = arith.constant 0 : i32
    %c0_i32_0 = arith.constant 0 : i32
    %c0_i32_1 = arith.constant 0 : i32
    return %c0_i32, %c0_i32_0 : i32, i32
  }
  func.func @transform_11(%arg0: i32) -> (i32, i32) {
    %c0_i32 = arith.constant 0 : i32
    %c0_i32_0 = arith.constant 0 : i32
    return %c0_i32, %arg0 : i32, i32
  }
}

</mosaic_0001>

<bundles_post_ra>
// kernel: tpu_custom_call.1
= control target key start
LH: loop header
LB: loop body
LE: loop exit
PB: predicated region body
PF: predicated region fallthrough
CT: control target
= control target key end

     0   :  { %16 = vsyncpa [#allocation3], 0  ;;  %s2949_s0 = inlined_call_operand.vmem [shape: f32[256,5], index: 0, kind: input, shape index: {}]   ;;  %s2950_s1 = inlined_call_operand.vmem [shape: f32[32,5], index: 1, kind: input, shape index: {}]   ;;  %s2951_s2 = inlined_call_operand.vmem [shape: f32[32,5], index: 2, kind: input, shape index: {}]   ;;  %s2952_s3 = inlined_call_operand.vmem [shape: f32[32,1], index: 3, kind: input, shape index: {}]   ;;  %s2953_s4 = inlined_call_operand.vmem [shape: f32[32,32], index: 4, kind: input, shape index: {}]   ;;  %s2954_s5 = inlined_call_operand.vmem [shape: f32[32,1], index: 5, kind: input, shape index: {}]   ;;  %s2955_s6 = inlined_call_operand.vmem [shape: f32[32,32], index: 6, kind: input, shape index: {}]   ;;  %s2956_s7 = inlined_call_operand.vmem [shape: f32[32,1], index: 7, kind: input, shape index: {}]   ;;  %s2957_s8 = inlined_call_operand.vmem [shape: f32[32,32], index: 8, kind: input, shape index: {}]   ;;  %s2958_s9 = inlined_call_operand.vmem [shape: f32[32,1], index: 9, kind: input, shape index: {}]   ;;  %s2959_s10 = inlined_call_operand.vmem [shape: f32[1,32], index: 10, kind: input, shape index: {}]   ;;  %s2960_s11 = inlined_call_operand.hbm [shape: f32[1,256], index: 11, kind: output, shape index: {}]  }
   0x1   :  { %18 = vsyncpa [#allocation3 + $0x1], 0  ;;  %s2319_s17 = smov 0   ;;  %s2321_s18 = smov 0  }
   0x2   :  { %s2323_s19 = smov 0   ;;  %s2325_s20 = smov 0  }
   0x3 LB: > { %2962 = sst [smem:[#allocation5_spill]] %s2248_s19  ;;  %s1692_s21 = sadd.s32 4294967295, %s2252_s20   ;;  %s2252_s20 = sphi %s2325_s20, %s2998_s20   ;;  %s2248_s19 = sphi %s2323_s19, %s2995_s19   ;;  %s2244_s18 = sphi %s2321_s18, %s2997_s18   ;;  %s2240_s17 = sphi %s2319_s17, %s2996_s17  }
   0x4   : > { %s1693_s22 = sadd.s32 4294967294, %s2252_s20   ;;  %s2342_s23 = sadd.s32 1, %s2252_s20  }
   0x5   : > { %s267_s24 = sadd.s32 1, %s2248_s19  ;;  %s264_s25 = ssub.s32 %s2252_s20, %s2342_s23 }
   0x6   : > { %p277_p0 = scmp.ne.s32.totalorder %s2248_s19, %s2244_s18  ;;  %p265_p1 = scmp.eq.s32.totalorder %s264_s25, 0 }
   0x7   : > { %p278_p2 = scmp.eq.s32.totalorder %s1692_s21, 1  ;;  %p283_p3 = scmp.ne.s32.totalorder %s2244_s18, %s2240_s17 }
   0x8   : > { %p284_p4 = scmp.eq.s32.totalorder %s1693_s22, 1  ;;  %p1696_p7 = scmp.ge.s32.totalorder %s2252_s20, 1 }
   0x9   : > { %s2352_s26 = scalar_select %p265_p1, %s2248_s19, %s267_s24  }
   0xa   : > { %p2354_p5 = por %p278_p2, %p277_p0  ;;  %p2358_p6 = por %p284_p4, %p283_p3 }
   0xb   : > { %2963 = sst [smem:[#allocation6_spill]] %s2352_s26  ;;  %p341_p8 = scmp.lt.s32.totalorder %s2252_s20, 3 }
   0xd   : > { %p342_p9 = pnand %p1696_p7, %p341_p8 }
   0xe   : > { %s2364_s29 = sshll.u32 (!%p342_p9), %s1692_s21, 4  ;;  %vm430_vm0 = vcmask (!%p342_p9), 39936   ;;  %v406_v0 = vld [vmem:[%s2950_s1] sm:$0xff] (!%p342_p9)  ;;  %v2254_v2 = vmov (!%p342_p9), 0   ;;  %v404_v4 = vld [vmem:[%s2952_s3 + $0x10] sm:$0xff] (!%p342_p9)  ;;  %v403_v5 = vld [vmem:[%s2952_s3 + $0x8] sm:$0xff] (!%p342_p9) }
   0xf   : > { %345 = sbr.rel (%p342_p9) target bundleno = 1404 (0x57c), region = 64  ;;  %v576_v1 = vld [vmem:[%s2951_s2] sm:$0xff] (!%p342_p9)  ;;  %p381_p10 = scmp.lt.s32.totalorder (!%p342_p9), %s2364_s29, 31  ;;  %1832 = vmatprep.mubr.msk.f32.mxu0 (!%p342_p9), %vm430_vm0, %v406_v0  ;;  %2060 = vset.pattern.permute.xlu0 (!%p342_p9), %v2254_v2  ;;  %v405_v6 = vld [vmem:[%s2952_s3 + $0x18] sm:$0xff] (!%p342_p9)  ;;  %vm2395_vm1 = vmpackc.low (!%p342_p9), %vm430_vm0, %vm430_vm0  ;;  %v2255_v50 = vmov (!%p342_p9), 0.0   ;;  %vm825_vm10 = vcmask (!%p342_p9), 261120  }
  0x10   : > { %1870 = vmatprep.mubr.msk.f32.mxu1 (!%p342_p9), %vm430_vm0, %v576_v1  ;;  %2061 = vset.pattern.permute.xlu1 (!%p342_p9), %v2254_v2  ;;  %v402_v3 = vld [vmem:[%s2952_s3] sm:$0xff] (!%p342_p9)  ;;  %v682_v15 = vld [vmem:[%s2954_s5 + $0x8] sm:$0xff] (!%p342_p9)  ;;  %v683_v18 = vld [vmem:[%s2954_s5 + $0x10] sm:$0xff] (!%p342_p9)  ;;  %s378_s21 = sand.u32 (!%p342_p9), 1, %s2244_s18   ;;  %s2907_s12 = scalar_lea.hbm (!%p342_p9), %s2960_s11, %s2364_s29 }
  0x11   : > { %412 = vperm.xlu0 (!%p342_p9), %2060, %v402_v3   ;;  %422 = vperm.xlu1 (!%p342_p9), %2061, %v404_v4   ;;  %v681_v14 = vld [vmem:[%s2954_s5] sm:$0xff] (!%p342_p9)  ;;  %v684_v19 = vld [vmem:[%s2954_s5 + $0x18] sm:$0xff] (!%p342_p9)  ;;  %v932_v22 = vld [vmem:[%s2956_s7 + $0x8] sm:$0xff] (!%p342_p9)  ;;  %s379_s22 = scalar_lea.vmem (!%p342_p9), [#allocation2], %s378_s21  ;;  %s1626_s13 = scalar_lea.sflag (!%p342_p9), [#allocation3], %s378_s21 }
  0x12   : > { %v931_v21 = vld [vmem:[%s2956_s7] sm:$0xff] (!%p342_p9)  ;;  %v933_v25 = vld [vmem:[%s2956_s7 + $0x10] sm:$0xff] (!%p342_p9)  ;;  %v934_v26 = vld [vmem:[%s2956_s7 + $0x18] sm:$0xff] (!%p342_p9)  ;;  %s1638_s24 = sshll.u32 (!%p342_p9), %s379_s22, 4  ;;  %s2258_s19 = smov (!%p342_p9), [#allocation2]   ;;  %s2909_s24 = int_to_ptr.vmem [resolvable:$true] %s1638_s24 }
  0x13   : > { %v1180_v28 = vld [vmem:[%s2958_s9] sm:$0xff] (!%p342_p9)  ;;  %v1181_v29 = vld [vmem:[%s2958_s9 + $0x8] sm:$0xff] (!%p342_p9)  ;;  %v1182_v32 = vld [vmem:[%s2958_s9 + $0x10] sm:$0xff] (!%p342_p9)  ;;  %s2190_s14 = scalar_lea.vmem (!%p342_p9), %s2909_s24, 16  ;;  %s2194_s26 = sshll.u32 (!%p342_p9), %s2258_s19, 4  ;;  %s2195_s26 = int_to_ptr.vmem [resolvable:$false] %s2194_s26 }
  0x14   : > { %v1183_v33 = vld [vmem:[%s2958_s9 + $0x18] sm:$0xff] (!%p342_p9)  ;;  %v407_v44 = vld [vmem:[%s2950_s1 + $0x8] sm:$0xff] (!%p342_p9)  ;;  %v408_v46 = vld [vmem:[%s2950_s1 + $0x10] sm:$0xff] (!%p342_p9)  ;;  %p2191_p11 = scmp.ne.s32.totalorder (!%p342_p9), %s2909_s24, %s2190_s14  ;;  %p2197_p0 = scmp.lt.s32.totalorder (!%p342_p9), %s2909_s24, %s2195_s26 }
  0x15   : > { %417 = vperm.xlu0 (!%p342_p9), %2060, %v403_v5   ;;  %427 = vperm.xlu1 (!%p342_p9), %2061, %v405_v6   ;;  %v577_v45 = vld [vmem:[%s2951_s2 + $0x8] sm:$0xff] (!%p342_p9)  ;;  %v578_v47 = vld [vmem:[%s2951_s2 + $0x10] sm:$0xff] (!%p342_p9)  ;;  %v409_v48 = vld [vmem:[%s2950_s1 + $0x18] sm:$0xff] (!%p342_p9) }
  0x16   : > { %s382_s15 = scalar_select %p381_p10, %s2364_s29, 31  ;;  %v579_v49 = vld [vmem:[%s2951_s2 + $0x18] sm:$0xff] }
  0x17   : > { %p2192_p12 = pnand %p2191_p11, %p2354_p5 }
  0x18   : > { %s1698_s25 = sshll.u32 %s382_s15, 3 }
  0x19   : > { %s2391_s16 = scalar_lea.vmem %s2949_s0, %s1698_s25  ;;  %807 = vperm.xlu0 %2060, %v681_v14   ;;  %812 = vperm.xlu1 %2061, %v682_v15   ;;  %p2193_p13 = pneg %p2192_p12 }
  0x1a   : > { %v386_v8 = vld [vmem:[%s2391_s16] sm:$0xff]  ;;  %v387_v9 = vld [vmem:[%s2391_s16 + $0x8] sm:$0xff]  ;;  %v388_v10 = vld [vmem:[%s2391_s16 + $0x10] sm:$0xff] }
  0x1b   : > { %v1887_v11 = vpack.c.bf16 %v387_v9, %v386_v8  ;;  %v389_v12 = vld [vmem:[%s2391_s16 + $0x18] sm:$0xff]  ;;  %v390_v16 = vld [vmem:[%s2391_s16 + $0x20] sm:$0xff]  ;;  %v391_v17 = vld [vmem:[%s2391_s16 + $0x28] sm:$0xff] }
  0x1c   : > { %v1893_v13 = vpack.c.bf16 %v389_v12, %v388_v10  ;;  %v1899_v20 = vpack.c.bf16 %v391_v17, %v390_v16  ;;  %v392_v23 = vld [vmem:[%s2391_s16 + $0x30] sm:$0xff]  ;;  %v393_v24 = vld [vmem:[%s2391_s16 + $0x38] sm:$0xff]  ;;  %v394_v30 = vld [vmem:[%s2391_s16 + $0x40] sm:$0xff] }
  0x1d   : > { %1889 = vmatprep.subr.msk.bf16.mxu0 %vm2395_vm1, %v1887_v11  ;;  %1937 = vmatprep.subr.msk.bf16.mxu1 %vm2395_vm1, %v1887_v11  ;;  %v1905_v27 = vpack.c.bf16 %v393_v24, %v392_v23  ;;  %v395_v31 = vld [vmem:[%s2391_s16 + $0x48] sm:$0xff]  ;;  %v396_v35 = vld [vmem:[%s2391_s16 + $0x50] sm:$0xff]  ;;  %v397_v36 = vld [vmem:[%s2391_s16 + $0x58] sm:$0xff] }
  0x1e   : > { %1892 = vmatpush3.bf16.xpose.msk.msra.mxu0 %vm2395_vm1, %v1887_v11  ;;  %1940 = vmatpush3.bf16.xpose.msk.msra.mxu1 %vm2395_vm1, %v1887_v11  ;;  %v1911_v34 = vpack.c.bf16 %v395_v31, %v394_v30  ;;  %v1917_v37 = vpack.c.bf16 %v397_v36, %v396_v35  ;;  %v398_v38 = vld [vmem:[%s2391_s16 + $0x60] sm:$0xff]  ;;  %v399_v39 = vld [vmem:[%s2391_s16 + $0x68] sm:$0xff]  ;;  %v400_v41 = vld [vmem:[%s2391_s16 + $0x70] sm:$0xff] }
  0x1f   : > { %1895 = vmatprep.subr.msk.bf16.mxu0 %vm2395_vm1, %v1893_v13  ;;  %1943 = vmatprep.subr.msk.bf16.mxu1 %vm2395_vm1, %v1893_v13  ;;  %v1923_v40 = vpack.c.bf16 %v399_v39, %v398_v38  ;;  %v401_v42 = vld [vmem:[%s2391_s16 + $0x78] sm:$0xff]  ;;  %s2196_s16 = scalar_lea.vmem %s2195_s26, 32 }
  0x20   : > { %817 = vperm.xlu0 %2060, %v683_v18   ;;  %822 = vperm.xlu1 %2061, %v684_v19   ;;  %v1929_v43 = vpack.c.bf16 %v401_v42, %v400_v41  ;;  %p2198_p1 = scmp.lt.s32.totalorder %s2196_s16, %s2190_s14 }
  0x22   : > { %p2199_p2 = por %p2198_p1, %p2197_p0 }
  0x24   : > { %1057 = vperm.xlu0 %2060, %v931_v21   ;;  %1062 = vperm.xlu1 %2061, %v932_v22   ;;  %p2200_p3 = pnand %p2199_p2, %p2193_p13 }
  0x26   : > { %1898 = vmatpush3.bf16.xpose.msk.msra.mxu0 %vm2395_vm1, %v1893_v13  ;;  %1946 = vmatpush3.bf16.xpose.msk.msra.mxu1 %vm2395_vm1, %v1893_v13 }
  0x27   : > { %1901 = vmatprep.subr.msk.bf16.mxu0 %vm2395_vm1, %v1899_v20  ;;  %1949 = vmatprep.subr.msk.bf16.mxu1 %vm2395_vm1, %v1899_v20 }
  0x28   : > { %1067 = vperm.xlu0 %2060, %v933_v25   ;;  %1072 = vperm.xlu1 %2061, %v934_v26  }
  0x2c   : > { %1306 = vperm.xlu0 %2060, %v1180_v28   ;;  %1311 = vperm.xlu1 %2061, %v1181_v29  }
  0x2e   : > { %1904 = vmatpush3.bf16.xpose.msk.msra.mxu0 %vm2395_vm1, %v1899_v20  ;;  %1952 = vmatpush3.bf16.xpose.msk.msra.mxu1 %vm2395_vm1, %v1899_v20 }
  0x2f   : > { %1907 = vmatprep.subr.msk.bf16.mxu0 %vm2395_vm1, %v1905_v27  ;;  %1955 = vmatprep.subr.msk.bf16.mxu1 %vm2395_vm1, %v1905_v27 }
  0x30   : > { %1316 = vperm.xlu0 %2060, %v1182_v32   ;;  %1321 = vperm.xlu1 %2061, %v1183_v33  }
  0x36   : > { %1910 = vmatpush3.bf16.xpose.msk.msra.mxu0 %vm2395_vm1, %v1905_v27  ;;  %1958 = vmatpush3.bf16.xpose.msk.msra.mxu1 %vm2395_vm1, %v1905_v27 }
  0x37   : > { %1913 = vmatprep.subr.msk.bf16.mxu0 %vm2395_vm1, %v1911_v34  ;;  %1961 = vmatprep.subr.msk.bf16.mxu1 %vm2395_vm1, %v1911_v34 }
  0x3e   : > { %1916 = vmatpush3.bf16.xpose.msk.msra.mxu0 %vm2395_vm1, %v1911_v34  ;;  %1964 = vmatpush3.bf16.xpose.msk.msra.mxu1 %vm2395_vm1, %v1911_v34 }
  0x3f   : > { %1919 = vmatprep.subr.msk.bf16.mxu0 %vm2395_vm1, %v1917_v37  ;;  %1967 = vmatprep.subr.msk.bf16.mxu1 %vm2395_vm1, %v1917_v37 }
  0x46   : > { %1922 = vmatpush3.bf16.xpose.msk.msra.mxu0 %vm2395_vm1, %v1917_v37  ;;  %1970 = vmatpush3.bf16.xpose.msk.msra.mxu1 %vm2395_vm1, %v1917_v37 }
  0x47   : > { %1925 = vmatprep.subr.msk.bf16.mxu0 %vm2395_vm1, %v1923_v40  ;;  %1973 = vmatprep.subr.msk.bf16.mxu1 %vm2395_vm1, %v1923_v40 }
  0x4e   : > { %1928 = vmatpush3.bf16.xpose.msk.msra.mxu0 %vm2395_vm1, %v1923_v40  ;;  %1976 = vmatpush3.bf16.xpose.msk.msra.mxu1 %vm2395_vm1, %v1923_v40 }
  0x4f   : > { %1931 = vmatprep.subr.msk.bf16.mxu0 %vm2395_vm1, %v1929_v43  ;;  %1979 = vmatprep.subr.msk.bf16.mxu1 %vm2395_vm1, %v1929_v43 }
  0x56   : > { %1934 = vmatpush3.bf16.xpose.msk.msra.mxu0 %vm2395_vm1, %v1929_v43  ;;  %1982 = vmatpush3.bf16.xpose.msk.msra.mxu1 %vm2395_vm1, %v1929_v43 }
  0x5d   : > { %1833 = vmatmul.mubr.msk.f32.vlgmr.msra.gmra.mrb[0].mxu0 %vm430_vm0, %v407_v44  ;;  %1871 = vmatmul.mubr.msk.f32.vlgmr.msra.gmra.mrb[0].mxu1 %vm430_vm0, %v577_v45 }
  0x5e   : > { %1835 = vmatprep.mubr.msk.f32.mxu0 %vm430_vm0, %v408_v46  ;;  %1873 = vmatprep.mubr.msk.f32.mxu1 %vm430_vm0, %v578_v47 }
  0x61   : > { %1836 = vmatmul.mubr.msk.f32.gmra.mrb[2].mxu0 %vm430_vm0, %v409_v48  ;;  %1874 = vmatmul.mubr.msk.f32.gmra.mrb[2].mxu1 %vm430_vm0, %v579_v49 }
  0x62   : > { %902 = vmatprep.mubr.f32.mxu0 %v2255_v50  ;;  %914 = vmatprep.mubr.f32.mxu1 %v2255_v50 }
  0x90   : > { %v413_v51 = vpop.permute.xlu0 %412  ;;  %v423_v52 = vpop.permute.xlu1 %422 }
  0x94   : > { %v418_v53 = vpop.permute.xlu0 %417  ;;  %v428_v0 = vpop.permute.xlu1 %427 }
 0x130   : > { %v1834_v54 = vpop.f32.mrb[0].mxu0  ;;  %v1872_v55 = vpop.f32.mrb[0].mxu1 }
 0x131   : > { %v2541_v56 = vadd.f32 %v1834_v54, %v418_v53  ;;  %v2543_v57 = vadd.f32 %v1872_v55, %v418_v53  ;;  %v557_v58 = vpop.f32.mrb[1].mxu0  ;;  %v658_v59 = vpop.f32.mrb[1].mxu1 }
 0x132   : > { %v2545_v60 = vadd.f32 %v557_v58, %v413_v51  ;;  %v2547_v61 = vadd.f32 %v658_v59, %v413_v51 }
 0x133   : > { %v695_v62 = vand.u32 2147483647, %v2541_v56  ;;  %v696_v63 = vand.u32 2147483647, %v2543_v57  ;;  %v687_v43 = vmax.f32 %v2541_v56, 0.0  ;;  %v688_v48 = vmax.f32 %v2543_v57, 0.0 }
 0x134   : > { %v693_v1 = vand.u32 2147483647, %v2545_v60  ;;  %v694_v2 = vand.u32 2147483647, %v2547_v61  ;;  %v1837_v5 = vpop.f32.mrb[2].mxu0  ;;  %v1875_v6 = vpop.f32.mrb[2].mxu1 }
 0x135   : > { %v703_v3 = vsub.f32 0.0, %v695_v62  ;;  %v704_v4 = vsub.f32 0.0, %v696_v63  ;;  %v2553_v9 = vadd.f32 %v1837_v5, %v428_v0  ;;  %v2555_v10 = vadd.f32 %v1875_v6, %v428_v0  ;;  %v567_v11 = vpop.f32.mrb[3].mxu0  ;;  %v668_v12 = vpop.f32.mrb[3].mxu1 }
 0x136   : > { %v701_v7 = vsub.f32 0.0, %v693_v1  ;;  %v702_v8 = vsub.f32 0.0, %v694_v2  ;;  %v2557_v15 = vadd.f32 %v567_v11, %v423_v52  ;;  %v2559_v16 = vadd.f32 %v668_v12, %v423_v52  ;;  %v813_v6 = vpop.permute.xlu1 %812 }
 0x137   : > { %v713_v13 = vmul.f32 1.442695, %v703_v3  ;;  %v715_v14 = vmul.f32 1.442695, %v704_v4  ;;  %v699_v19 = vand.u32 2147483647, %v2553_v9 }
 0x138   : > { %v709_v17 = vmul.f32 1.442695, %v701_v7  ;;  %v711_v18 = vmul.f32 1.442695, %v702_v8  ;;  %v700_v20 = vand.u32 2147483647, %v2555_v10 }
 0x139   : > { %2062 = vpow2.f32 %v713_v13  ;;  %v697_v21 = vand.u32 2147483647, %v2557_v15  ;;  %v698_v22 = vand.u32 2147483647, %v2559_v16  ;;  %v707_v23 = vsub.f32 0.0, %v699_v19 }
 0x13a   : > { %2064 = vpow2.f32 %v715_v14  ;;  %v708_v24 = vsub.f32 0.0, %v700_v20  ;;  %v685_v51 = vmax.f32 %v2545_v60, 0.0  ;;  %v686_v56 = vmax.f32 %v2547_v61, 0.0 }
 0x13b   : > { %2066 = vpow2.f32 %v709_v17  ;;  %v705_v25 = vsub.f32 0.0, %v697_v21  ;;  %v706_v26 = vsub.f32 0.0, %v698_v22  ;;  %v721_v27 = vmul.f32 1.442695, %v707_v23  ;;  %v823_v21 = vpop.permute.xlu1 %822 }
 0x13c   : > { %2068 = vpow2.f32 %v711_v18  ;;  %v723_v28 = vmul.f32 1.442695, %v708_v24  ;;  %v691_v59 = vmax.f32 %v2553_v9, 0.0  ;;  %v692_v57 = vmax.f32 %v2555_v10, 0.0  ;;  %v679_v10 = vld [vmem:[%s2953_s4 + $0x10] sm:$0xff] }
 0x13d   : > { %v717_v29 = vmul.f32 1.442695, %v705_v25  ;;  %v719_v30 = vmul.f32 1.442695, %v706_v26  ;;  %2070 = vpow2.f32 %v721_v27 }
 0x13e   : > { %2072 = vpow2.f32 %v723_v28 }
 0x13f   : > { %2074 = vpow2.f32 %v717_v29 }
 0x140   : > { %2076 = vpow2.f32 %v719_v30 }
 0x143   : > { %v2063_v31 = vpop.eup %2062 }
 0x144   : > { %v2065_v32 = vpop.eup %2064  ;;  %v743_v33 = vadd.f32 1.0, %v2063_v31  ;;  %v746_v38 = vmul.f32 -0.5, %v2063_v31  ;;  %v749_v47 = vand.u32 2147483647, %v2063_v31 }
 0x145   : > { %v2067_v34 = vpop.eup %2066  ;;  %v752_v35 = vadd.f32 1.0, %v2065_v32  ;;  %v755_v39 = vmul.f32 -0.5, %v2065_v32  ;;  %v758_v49 = vand.u32 2147483647, %v2065_v32 }
 0x146   : > { %v2069_v36 = vpop.eup %2068  ;;  %2078 = vlog2.f32 %v743_v33  ;;  %v725_v37 = vadd.f32 1.0, %v2067_v34  ;;  %v728_v44 = vmul.f32 -0.5, %v2067_v34  ;;  %v747_v53 = vadd.f32 1.0, %v746_v38 }
 0x147   : > { %2080 = vlog2.f32 %v752_v35  ;;  %v734_v40 = vadd.f32 1.0, %v2069_v36  ;;  %v2565_v41 = vpop.eup %2070  ;;  %v756_v54 = vadd.f32 1.0, %v755_v39  ;;  %v737_v58 = vmul.f32 -0.5, %v2069_v36 }
 0x148   : > { %2082 = vlog2.f32 %v725_v37  ;;  %v2567_v42 = vpop.eup %2072  ;;  %v779_v45 = vadd.f32 1.0, %v2565_v41  ;;  %v729_v63 = vadd.f32 1.0, %v728_v44  ;;  %v731_v0 = vand.u32 2147483647, %v2067_v34 }
 0x149   : > { %2084 = vlog2.f32 %v734_v40  ;;  %v2571_v46 = vpop.eup %2074  ;;  %v788_v55 = vadd.f32 1.0, %v2567_v42  ;;  %v740_v60 = vand.u32 2147483647, %v2069_v36  ;;  %v782_v1 = vmul.f32 -0.5, %v2565_v41 }
 0x14a   : > { %v2575_v52 = vpop.eup %2076  ;;  %2086 = vlog2.f32 %v779_v45  ;;  %v761_v62 = vadd.f32 1.0, %v2571_v46  ;;  %v748_v4 = vmul.f32 %v2063_v31, %v747_v53  ;;  %vm2584_vm2 = vcmp.lt.f32.partialorder %v749_v47, 0.0004427343 }
 0x14b   : > { %2088 = vlog2.f32 %v788_v55  ;;  %v770_v2 = vadd.f32 1.0, %v2575_v52  ;;  %v757_v5 = vmul.f32 %v2065_v32, %v756_v54  ;;  %vm2588_vm3 = vcmp.lt.f32.partialorder %v758_v49, 0.0004427343 }
 0x14c   : > { %2090 = vlog2.f32 %v761_v62  ;;  %v738_v9 = vadd.f32 1.0, %v737_v58  ;;  %v791_v11 = vmul.f32 -0.5, %v2567_v42  ;;  %v730_v14 = vmul.f32 %v2067_v34, %v729_v63 }
 0x14d   : > { %2092 = vlog2.f32 %v770_v2  ;;  %vm2593_vm4 = vcmp.lt.f32.partialorder %v731_v0, 0.0004427343  ;;  %v764_v18 = vmul.f32 -0.5, %v2571_v46  ;;  %vm2600_vm5 = vcmp.lt.f32.partialorder %v740_v60, 0.0004427343 }
 0x14e   : > { %v783_v22 = vadd.f32 1.0, %v782_v1  ;;  %v785_v26 = vand.u32 2147483647, %v2565_v41  ;;  %v773_v27 = vmul.f32 -0.5, %v2575_v52  ;;  %v739_v30 = vmul.f32 %v2069_v36, %v738_v9 }
 0x14f   : > { %v792_v31 = vadd.f32 1.0, %v791_v11  ;;  %v794_v35 = vand.u32 2147483647, %v2567_v42  ;;  %v765_v37 = vadd.f32 1.0, %v764_v18  ;;  %v776_v54 = vand.u32 2147483647, %v2575_v52 }
 0x150   : > { %v2079_v3 = vpop.eup %2078  ;;  %v784_v40 = vmul.f32 %v2565_v41, %v783_v22  ;;  %vm786_vm6 = vcmp.lt.f32.partialorder %v785_v26, 0.0004427343  ;;  %v774_v36 = vadd.f32 1.0, %v773_v27  ;;  %v689_v60 = vmax.f32 %v2557_v15, 0.0 }
 0x151   : > { %v2081_v7 = vpop.eup %2080  ;;  %v745_v8 = vmul.f32 0.6931472, %v2079_v3  ;;  %vm795_vm7 = vcmp.lt.f32.partialorder %v794_v35, 0.0004427343  ;;  %v766_v58 = vmul.f32 %v2571_v46, %v765_v37  ;;  %vm777_vm9 = vcmp.lt.f32.partialorder %v776_v54, 0.0004427343 }
 0x152   : > { %v2083_v12 = vpop.eup %2082  ;;  %v754_v13 = vmul.f32 0.6931472, %v2081_v7  ;;  %v775_v2 = vmul.f32 %v2575_v52, %v774_v36  ;;  %v677_v52 = vld [vmem:[%s2953_s4] sm:$0xff] }
 0x153   : > { %v751_v19 = vsel %vm2584_vm2, %v748_v4, %v745_v8  ;;  %v727_v20 = vmul.f32 0.6931472, %v2083_v12  ;;  %v2085_v23 = vpop.eup %2084  ;;  %v690_v4 = vmax.f32 %v2559_v16, 0.0  ;;  %v678_v16 = vld [vmem:[%s2953_s4 + $0x8] sm:$0xff] }
 0x154   : > { %v799_v24 = vadd.f32 %v751_v19, %v687_v43  ;;  %v760_v25 = vsel %vm2588_vm3, %v757_v5, %v754_v13  ;;  %v736_v29 = vmul.f32 0.6931472, %v2085_v23  ;;  %v2087_v32 = vpop.eup %2086  ;;  %v767_v43 = vand.u32 2147483647, %v2571_v46  ;;  %v808_v5 = vpop.permute.xlu0 %807 }
 0x155   : > { %v733_v28 = vsel %vm2593_vm4, %v730_v14, %v727_v20  ;;  %v800_v33 = vadd.f32 %v760_v25, %v688_v48  ;;  %v781_v39 = vmul.f32 0.6931472, %v2087_v32  ;;  %v2089_v44 = vpop.eup %2088 }
 0x156   : > { %v797_v34 = vadd.f32 %v733_v28, %v685_v51  ;;  %v742_v38 = vsel %vm2600_vm5, %v739_v30, %v736_v29  ;;  %v2091_v49 = vpop.eup %2090  ;;  %v790_v48 = vmul.f32 0.6931472, %v2089_v44  ;;  %v793_v51 = vmul.f32 %v2567_v42, %v792_v31 }
 0x157   : > { %v798_v47 = vadd.f32 %v742_v38, %v686_v56  ;;  %v787_v53 = vsel %vm786_vm6, %v784_v40, %v781_v39  ;;  %v763_v55 = vmul.f32 0.6931472, %v2091_v49  ;;  %v2093_v41 = vpop.eup %2092  ;;  %vm768_vm8 = vcmp.lt.f32.partialorder %v767_v43, 0.0004427343 }
 0x158   : > { %v1985_v45 = vpack.c.bf16 %v799_v24, %v797_v34  ;;  %v803_v63 = vadd.f32 %v787_v53, %v691_v59  ;;  %v796_v0 = vsel %vm795_vm7, %v793_v51, %v790_v48  ;;  %v772_v1 = vmul.f32 0.6931472, %v2093_v41  ;;  %v818_v7 = vpop.permute.xlu0 %817 }
 0x159   : > { %v1983_v62 = vpack.c.bf16 %v800_v33, %v798_v47  ;;  %v769_v56 = vsel %vm768_vm8, %v766_v58, %v763_v55  ;;  %v804_v42 = vadd.f32 %v796_v0, %v692_v57  ;;  %v680_v57 = vld [vmem:[%s2953_s4 + $0x18] sm:$0xff] }
 0x15a   : > { %v801_v3 = vadd.f32 %v769_v56, %v689_v60  ;;  %v778_v46 = vsel %vm777_vm9, %v775_v2, %v772_v1 }
 0x15b   : > { %1984 = vmatprep.subr.bf16.mxu0 %v1983_v62  ;;  %2013 = vmatprep.subr.bf16.mxu1 %v1983_v62  ;;  %v802_v61 = vadd.f32 %v778_v46, %v690_v4 }
 0x15c   : > { %1986 = vmatpush1.bf16.msra.mxu0 %v1985_v45  ;;  %2015 = vmatpush1.bf16.msra.mxu1 %v1985_v45  ;;  %v1989_v59 = vpack.c.bf16 %v803_v63, %v801_v3 }
 0x15d   : > { %v1987_v15 = vpack.c.bf16 %v804_v42, %v802_v61 }
 0x15f   : > { %1988 = vmatprep.subr.bf16.mxu0 %v1987_v15  ;;  %2014 = vmatprep.subr.bf16.mxu1 %v1987_v15 }
 0x160   : > { %1990 = vmatpush1.bf16.msra.mxu0 %v1989_v59  ;;  %2016 = vmatpush1.bf16.msra.mxu1 %v1989_v59 }
 0x163   : > { %1739 = vmatmul.mubr.msk.f32.vlgmr.msra.gmra.mrb[4].mxu0 %vm825_vm10, %v677_v52  ;;  %1741 = vmatmul.mubr.msk.f32.vlgmr.msra.gmra.mrb[4].mxu1 %vm825_vm10, %v679_v10 }
 0x164   : > { %908 = vmatprep.mubr.f32.mxu0 %v2255_v50  ;;  %920 = vmatprep.mubr.f32.mxu1 %v2255_v50 }
 0x167   : > { %1740 = vmatmul.mubr.msk.f32.gmra.mrb[6].mxu0 %vm825_vm10, %v678_v16  ;;  %1742 = vmatmul.mubr.msk.f32.gmra.mrb[6].mxu1 %vm825_vm10, %v680_v57 }
 0x168   : > { %1151 = vmatprep.mubr.f32.mxu1 %v2255_v50  ;;  %1400 = vmatprep.mubr.f32.mxu0 %v2255_v50 }
 0x236   : > { %v904_v8 = vpop.f32.mrb[4].mxu0  ;;  %v916_v9 = vpop.f32.mrb[4].mxu1 }
 0x237   : > { %v2643_v11 = vadd.f32 %v904_v8, %v808_v5  ;;  %v2645_v12 = vadd.f32 %v916_v9, %v818_v7  ;;  %v906_v13 = vpop.f32.mrb[5].mxu0  ;;  %v918_v14 = vpop.f32.mrb[5].mxu1 }
 0x238   : > { %v2647_v17 = vadd.f32 %v906_v13, %v808_v5  ;;  %v2649_v18 = vadd.f32 %v918_v14, %v818_v7 }
 0x239   : > { %v943_v19 = vand.u32 2147483647, %v2643_v11  ;;  %v947_v20 = vand.u32 2147483647, %v2645_v12  ;;  %v935_v4 = vmax.f32 %v2643_v11, 0.0  ;;  %v939_v15 = vmax.f32 %v2645_v12, 0.0 }
 0x23a   : > { %v944_v22 = vand.u32 2147483647, %v2647_v17  ;;  %v948_v23 = vand.u32 2147483647, %v2649_v18  ;;  %v910_v26 = vpop.f32.mrb[6].mxu0  ;;  %v922_v27 = vpop.f32.mrb[6].mxu1 }
 0x23b   : > { %v951_v24 = vsub.f32 0.0, %v943_v19  ;;  %v955_v25 = vsub.f32 0.0, %v947_v20  ;;  %v2655_v30 = vadd.f32 %v910_v26, %v813_v6  ;;  %v2657_v31 = vadd.f32 %v922_v27, %v823_v21  ;;  %v912_v32 = vpop.f32.mrb[7].mxu0  ;;  %v924_v33 = vpop.f32.mrb[7].mxu1 }
 0x23c   : > { %v952_v28 = vsub.f32 0.0, %v944_v22  ;;  %v956_v29 = vsub.f32 0.0, %v948_v23  ;;  %v2659_v37 = vadd.f32 %v912_v32, %v813_v6  ;;  %v2661_v38 = vadd.f32 %v924_v33, %v823_v21 }
 0x23d   : > { %v959_v34 = vmul.f32 1.442695, %v951_v24  ;;  %v967_v35 = vmul.f32 1.442695, %v955_v25  ;;  %v945_v43 = vand.u32 2147483647, %v2655_v30 }
 0x23e   : > { %v961_v39 = vmul.f32 1.442695, %v952_v28  ;;  %v969_v40 = vmul.f32 1.442695, %v956_v29  ;;  %v949_v44 = vand.u32 2147483647, %v2657_v31 }
 0x23f   : > { %2094 = vpow2.f32 %v959_v34  ;;  %v946_v45 = vand.u32 2147483647, %v2659_v37  ;;  %v950_v47 = vand.u32 2147483647, %v2661_v38  ;;  %v953_v36 = vsub.f32 0.0, %v945_v43 }
 0x240   : > { %2096 = vpow2.f32 %v967_v35  ;;  %v957_v49 = vsub.f32 0.0, %v949_v44  ;;  %v936_v52 = vmax.f32 %v2647_v17, 0.0  ;;  %v940_v10 = vmax.f32 %v2649_v18, 0.0  ;;  %v927_v17 = vld [vmem:[%s2955_s6] sm:$0xff]  ;;  %v928_v18 = vld [vmem:[%s2955_s6 + $0x8] sm:$0xff] }
 0x241   : > { %2098 = vpow2.f32 %v961_v39  ;;  %v954_v53 = vsub.f32 0.0, %v946_v45  ;;  %v958_v48 = vsub.f32 0.0, %v950_v47  ;;  %v963_v51 = vmul.f32 1.442695, %v953_v36 }
 0x242   : > { %2100 = vpow2.f32 %v969_v40  ;;  %v971_v54 = vmul.f32 1.442695, %v957_v49  ;;  %v937_v8 = vmax.f32 %v2655_v30, 0.0  ;;  %v941_v9 = vmax.f32 %v2657_v31, 0.0  ;;  %v929_v31 = vld [vmem:[%s2955_s6 + $0x10] sm:$0xff] }
 0x243   : > { %v965_v55 = vmul.f32 1.442695, %v954_v53  ;;  %v973_v58 = vmul.f32 1.442695, %v958_v48  ;;  %2102 = vpow2.f32 %v963_v51  ;;  %v938_v28 = vmax.f32 %v2659_v37, 0.0 }
 0x244   : > { %2104 = vpow2.f32 %v971_v54  ;;  %v942_v12 = vmax.f32 %v2661_v38, 0.0  ;;  %v930_v38 = vld [vmem:[%s2955_s6 + $0x18] sm:$0xff] }
 0x245   : > { %2106 = vpow2.f32 %v965_v55 }
 0x246   : > { %2108 = vpow2.f32 %v973_v58 }
 0x249   : > { %v2095_v62 = vpop.eup %2094 }
 0x24a   : > { %v2097_v41 = vpop.eup %2096  ;;  %v975_v63 = vadd.f32 1.0, %v2095_v62  ;;  %v978_v61 = vmul.f32 -0.5, %v2095_v62  ;;  %v981_v57 = vand.u32 2147483647, %v2095_v62 }
 0x24b   : > { %v2099_v0 = vpop.eup %2098  ;;  %v1011_v60 = vadd.f32 1.0, %v2097_v41  ;;  %v1014_v5 = vmul.f32 -0.5, %v2097_v41  ;;  %v1017_v14 = vand.u32 2147483647, %v2097_v41 }
 0x24c   : > { %v2667_v56 = vpop.eup %2100  ;;  %2110 = vlog2.f32 %v975_v63  ;;  %v984_v1 = vadd.f32 1.0, %v2099_v0  ;;  %v987_v7 = vmul.f32 -0.5, %v2099_v0  ;;  %v979_v21 = vadd.f32 1.0, %v978_v61 }
 0x24d   : > { %2112 = vlog2.f32 %v1011_v60  ;;  %v1020_v2 = vadd.f32 1.0, %v2667_v56  ;;  %v2103_v42 = vpop.eup %2102  ;;  %v1023_v19 = vmul.f32 -0.5, %v2667_v56  ;;  %v990_v22 = vand.u32 2147483647, %v2099_v0 }
 0x24e   : > { %2114 = vlog2.f32 %v984_v1  ;;  %v2670_v3 = vpop.eup %2104  ;;  %v993_v46 = vadd.f32 1.0, %v2103_v42  ;;  %v996_v20 = vmul.f32 -0.5, %v2103_v42  ;;  %vm2686_vm11 = vcmp.lt.f32.partialorder %v981_v57, 0.0004427343 }
 0x24f   : > { %2116 = vlog2.f32 %v1020_v2  ;;  %v2673_v59 = vpop.eup %2106  ;;  %v1029_v6 = vadd.f32 1.0, %v2670_v3  ;;  %v1015_v26 = vadd.f32 1.0, %v1014_v5  ;;  %v1032_v27 = vmul.f32 -0.5, %v2670_v3 }
 0x250   : > { %v2678_v16 = vpop.eup %2108  ;;  %2118 = vlog2.f32 %v993_v46  ;;  %v1002_v13 = vadd.f32 1.0, %v2673_v59  ;;  %v988_v30 = vadd.f32 1.0, %v987_v7  ;;  %v1026_v32 = vand.u32 2147483647, %v2667_v56 }
 0x251   : > { %2120 = vlog2.f32 %v1029_v6  ;;  %v1038_v23 = vadd.f32 1.0, %v2678_v16  ;;  %v1005_v33 = vmul.f32 -0.5, %v2673_v59  ;;  %vm2694_vm12 = vcmp.lt.f32.partialorder %v1017_v14, 0.0004427343 }
 0x252   : > { %2122 = vlog2.f32 %v1002_v13  ;;  %v1024_v35 = vadd.f32 1.0, %v1023_v19  ;;  %v997_v39 = vadd.f32 1.0, %v996_v20  ;;  %v999_v40 = vand.u32 2147483647, %v2103_v42 }
 0x253   : > { %2124 = vlog2.f32 %v1038_v23  ;;  %v980_v45 = vmul.f32 %v2095_v62, %v979_v21  ;;  %vm2698_vm13 = vcmp.lt.f32.partialorder %v990_v22, 0.0004427343  ;;  %v1041_v37 = vmul.f32 -0.5, %v2678_v16 }
 0x254   : > { %v1016_v53 = vmul.f32 %v2097_v41, %v1015_v26  ;;  %v1033_v48 = vadd.f32 1.0, %v1032_v27  ;;  %v1035_v51 = vand.u32 2147483647, %v2670_v3  ;;  %v989_v54 = vmul.f32 %v2099_v0, %v988_v30 }
 0x255   : > { %vm2704_vm14 = vcmp.lt.f32.partialorder %v1026_v32, 0.0004427343  ;;  %v1006_v58 = vadd.f32 1.0, %v1005_v33  ;;  %v1008_v62 = vand.u32 2147483647, %v2673_v59  ;;  %v1025_v1 = vmul.f32 %v2667_v56, %v1024_v35 }
 0x256   : > { %v2111_v24 = vpop.eup %2110  ;;  %v998_v2 = vmul.f32 %v2103_v42, %v997_v39  ;;  %vm2710_vm15 = vcmp.lt.f32.partialorder %v999_v40, 0.0004427343  ;;  %v1042_v57 = vadd.f32 1.0, %v1041_v37  ;;  %v1034_v7 = vmul.f32 %v2670_v3, %v1033_v48 }
 0x257   : > { %v2113_v29 = vpop.eup %2112  ;;  %v977_v44 = vmul.f32 0.6931472, %v2111_v24  ;;  %vm2719_vm0 = vcmp.lt.f32.partialorder %v1035_v51, 0.0004427343  ;;  %v1044_v56 = vand.u32 2147483647, %v2678_v16  ;;  %v1007_v20 = vmul.f32 %v2673_v59, %v1006_v58 }
 0x258   : > { %v2115_v43 = vpop.eup %2114  ;;  %v1013_v49 = vmul.f32 0.6931472, %v2113_v29  ;;  %vm1009_vm1 = vcmp.lt.f32.partialorder %v1008_v62, 0.0004427343  ;;  %v1043_v59 = vmul.f32 %v2678_v16, %v1042_v57 }
 0x259   : > { %v2117_v36 = vpop.eup %2116  ;;  %v986_v60 = vmul.f32 0.6931472, %v2115_v43  ;;  %v983_v41 = vsel %vm2686_vm11, %v980_v45, %v977_v44  ;;  %vm1045_vm2 = vcmp.lt.f32.partialorder %v1044_v56, 0.0004427343  ;;  %v1063_v44 = vpop.permute.xlu1 %1062 }
 0x25a   : > { %v2119_v63 = vpop.eup %2118  ;;  %v1022_v0 = vmul.f32 0.6931472, %v2117_v36  ;;  %v1019_v6 = vsel %vm2694_vm12, %v1016_v53, %v1013_v49  ;;  %v1047_v21 = vadd.f32 %v983_v41, %v935_v4  ;;  %vm2257_vm12 = vmmov 0  }
 0x25b   : > { %v995_v61 = vmul.f32 0.6931472, %v2119_v63  ;;  %v2121_v5 = vpop.eup %2120  ;;  %v992_v3 = vsel %vm2698_vm13, %v989_v54, %v986_v60  ;;  %v1051_v25 = vadd.f32 %v1019_v6, %v939_v15 }
 0x25c   : > { %v2123_v42 = vpop.eup %2122  ;;  %v1031_v19 = vmul.f32 0.6931472, %v2121_v5  ;;  %v1028_v26 = vsel %vm2704_vm14, %v1025_v1, %v1022_v0 }
 0x25d   : > { %v1001_v14 = vsel %vm2710_vm15, %v998_v2, %v995_v61  ;;  %v1004_v23 = vmul.f32 0.6931472, %v2123_v42  ;;  %v2125_v24 = vpop.eup %2124  ;;  %v1052_v34 = vadd.f32 %v1028_v26, %v940_v10  ;;  %v1073_v57 = vpop.permute.xlu1 %1072 }
 0x25e   : > { %v1049_v22 = vadd.f32 %v1001_v14, %v937_v8  ;;  %v1037_v27 = vsel %vm2719_vm0, %v1034_v7, %v1031_v19  ;;  %v1040_v30 = vmul.f32 0.6931472, %v2125_v24  ;;  %v1048_v8 = vadd.f32 %v992_v3, %v936_v52  ;;  %v1058_v52 = vpop.permute.xlu0 %1057 }
 0x25f   : > { %v1053_v11 = vadd.f32 %v1037_v27, %v941_v9  ;;  %v1010_v4 = vsel %vm1009_vm1, %v1007_v20, %v1004_v23 }
 0x260   : > { %v1993_v29 = vpack.c.bf16 %v1049_v22, %v1047_v21  ;;  %v1050_v32 = vadd.f32 %v1010_v4, %v938_v28  ;;  %v1046_v33 = vsel %vm1045_vm2, %v1043_v59, %v1040_v30 }
 0x261   : > { %v1997_v15 = vpack.c.bf16 %v1053_v11, %v1051_v25  ;;  %v1054_v35 = vadd.f32 %v1046_v33, %v942_v12 }
 0x262   : > { %v1991_v16 = vpack.c.bf16 %v1050_v32, %v1048_v8  ;;  %v1068_v55 = vpop.permute.xlu0 %1067 }
 0x263   : > { %v1995_v39 = vpack.c.bf16 %v1054_v35, %v1052_v34 }
 0x264   : > { %1992 = vmatprep.subr.bf16.mxu1 %v1991_v16 }
 0x265   : > { %1994 = vmatpush1.bf16.msra.mxu1 %v1993_v29 }
 0x266   : > { %1996 = vmatprep.subr.bf16.mxu1 %v1995_v39 }
 0x269   : > { %1998 = vmatpush1.bf16.msra.mxu1 %v1997_v15 }
 0x26c   : > { %1743 = vmatmul.mubr.msk.f32.vlgmr.msra.gmra.mrb[8].mxu1 %vm825_vm10, %v927_v17 }
 0x26d   : > { %1157 = vmatprep.mubr.f32.mxu1 %v2255_v50 }
 0x270   : > { %1744 = vmatmul.mubr.msk.f32.gmra.mrb[10].mxu1 %vm825_vm10, %v928_v18 }
 0x271   : > { %1163 = vmatprep.mubr.f32.mxu1 %v2255_v50 }
 0x274   : > { %1745 = vmatmul.mubr.msk.f32.gmra.mrb[12].mxu1 %vm825_vm10, %v929_v31 }
 0x275   : > { %1169 = vmatprep.mubr.f32.mxu1 %v2255_v50 }
 0x278   : > { %1746 = vmatmul.mubr.msk.f32.gmra.mrb[14].mxu1 %vm825_vm10, %v930_v38 }
 0x279   : > { %1884 = vmatprep.mubr.msk.f32.mxu1 %vm2257_vm12, %v2255_v50 }
 0x33f   : > { %v1153_v10 = vpop.f32.mrb[8].mxu1 }
 0x340   : > { %v2764_v9 = vadd.f32 %v1153_v10, %v1058_v52  ;;  %v1155_v28 = vpop.f32.mrb[9].mxu1 }
 0x341   : > { %v2766_v40 = vadd.f32 %v1155_v28, %v1058_v52 }
 0x342   : > { %v1192_v43 = vand.u32 2147483647, %v2764_v9  ;;  %v1184_v18 = vmax.f32 %v2764_v9, 0.0 }
 0x343   : > { %v1193_v45 = vand.u32 2147483647, %v2766_v40  ;;  %v1159_v47 = vpop.f32.mrb[10].mxu1  ;;  %v1185_v38 = vmax.f32 %v2766_v40, 0.0 }
 0x344   : > { %v1200_v37 = vsub.f32 0.0, %v1192_v43  ;;  %v2770_v36 = vadd.f32 %v1159_v47, %v1063_v44  ;;  %v1161_v49 = vpop.f32.mrb[11].mxu1 }
 0x345   : > { %v1201_v53 = vsub.f32 0.0, %v1193_v45  ;;  %v2772_v48 = vadd.f32 %v1161_v49, %v1063_v44 }
 0x346   : > { %v1208_v51 = vmul.f32 1.442695, %v1200_v37  ;;  %v1194_v54 = vand.u32 2147483647, %v2770_v36  ;;  %v1186_v37 = vmax.f32 %v2770_v36, 0.0 }
 0x347   : > { %v1210_v58 = vmul.f32 1.442695, %v1201_v53  ;;  %v1195_v62 = vand.u32 2147483647, %v2772_v48  ;;  %v1165_v63 = vpop.f32.mrb[12].mxu1 }
 0x348   : > { %2126 = vpow2.f32 %v1208_v51  ;;  %v1202_v60 = vsub.f32 0.0, %v1194_v54  ;;  %v2776_v1 = vadd.f32 %v1165_v63, %v1068_v55  ;;  %v1167_v2 = vpop.f32.mrb[13].mxu1  ;;  %v1307_v63 = vpop.permute.xlu0 %1306 }
 0x349   : > { %2128 = vpow2.f32 %v1210_v58  ;;  %v1203_v46 = vsub.f32 0.0, %v1195_v62  ;;  %v2778_v41 = vadd.f32 %v1167_v2, %v1068_v55  ;;  %v1187_v55 = vmax.f32 %v2772_v48, 0.0 }
 0x34a   : > { %v1212_v0 = vmul.f32 1.442695, %v1202_v60  ;;  %v1196_v61 = vand.u32 2147483647, %v2776_v1 }
 0x34b   : > { %v1214_v5 = vmul.f32 1.442695, %v1203_v46  ;;  %v1197_v6 = vand.u32 2147483647, %v2778_v41  ;;  %v1171_v7 = vpop.f32.mrb[14].mxu1 }
 0x34c   : > { %2130 = vpow2.f32 %v1212_v0  ;;  %v1204_v13 = vsub.f32 0.0, %v1196_v61  ;;  %v2782_v56 = vadd.f32 %v1171_v7, %v1073_v57  ;;  %v1173_v42 = vpop.f32.mrb[15].mxu1 }
 0x34d   : > { %2132 = vpow2.f32 %v1214_v5  ;;  %v1205_v14 = vsub.f32 0.0, %v1197_v6  ;;  %v2785_v22 = vadd.f32 %v1173_v42, %v1073_v57 }
 0x34e   : > { %v1216_v19 = vmul.f32 1.442695, %v1204_v13  ;;  %v1198_v20 = vand.u32 2147483647, %v2782_v56 }
 0x34f   : > { %v1218_v21 = vmul.f32 1.442695, %v1205_v14  ;;  %v1199_v59 = vand.u32 2147483647, %v2785_v22 }
 0x350   : > { %2134 = vpow2.f32 %v1216_v19  ;;  %v1206_v3 = vsub.f32 0.0, %v1198_v20 }
 0x351   : > { %2136 = vpow2.f32 %v1218_v21  ;;  %v1207_v8 = vsub.f32 0.0, %v1199_v59 }
 0x352   : > { %v2127_v23 = vpop.eup %2126  ;;  %v1220_v24 = vmul.f32 1.442695, %v1206_v3 }
 0x353   : > { %v2129_v25 = vpop.eup %2128  ;;  %v1224_v26 = vadd.f32 1.0, %v2127_v23  ;;  %v1227_v12 = vmul.f32 -0.5, %v2127_v23  ;;  %v1222_v35 = vmul.f32 1.442695, %v1207_v8  ;;  %v1230_v10 = vand.u32 2147483647, %v2127_v23 }
 0x354   : > { %v1233_v27 = vadd.f32 1.0, %v2129_v25  ;;  %2138 = vpow2.f32 %v1220_v24  ;;  %v1236_v15 = vmul.f32 -0.5, %v2129_v25  ;;  %v1239_v43 = vand.u32 2147483647, %v2129_v25 }
 0x355   : > { %2140 = vlog2.f32 %v1224_v26  ;;  %v1228_v31 = vadd.f32 1.0, %v1227_v12  ;;  %vm2801_vm3 = vcmp.lt.f32.partialorder %v1230_v10, 0.0004427343 }
 0x356   : > { %v2131_v29 = vpop.eup %2130  ;;  %2142 = vlog2.f32 %v1233_v27  ;;  %v1237_v28 = vadd.f32 1.0, %v1236_v15  ;;  %vm2805_vm4 = vcmp.lt.f32.partialorder %v1239_v43, 0.0004427343 }
 0x357   : > { %v2133_v11 = vpop.eup %2132  ;;  %v1242_v4 = vadd.f32 1.0, %v2131_v29  ;;  %v1245_v34 = vmul.f32 -0.5, %v2131_v29  ;;  %v1248_v51 = vand.u32 2147483647, %v2131_v29  ;;  %v1229_v9 = vmul.f32 %v2127_v23, %v1228_v31 }
 0x358   : > { %v1251_v30 = vadd.f32 1.0, %v2133_v11  ;;  %v1254_v39 = vmul.f32 -0.5, %v2133_v11  ;;  %v1257_v40 = vand.u32 2147483647, %v2133_v11  ;;  %v1238_v60 = vmul.f32 %v2129_v25, %v1237_v28 }
 0x359   : > { %2144 = vlog2.f32 %v1242_v4  ;;  %v1246_v49 = vadd.f32 1.0, %v1245_v34  ;;  %vm1249_vm5 = vcmp.lt.f32.partialorder %v1248_v51, 0.0004427343  ;;  %v1188_v34 = vmax.f32 %v2776_v1, 0.0 }
 0x35a   : > { %v2788_v32 = vpop.eup %2134  ;;  %2146 = vlog2.f32 %v1251_v30  ;;  %v1255_v54 = vadd.f32 1.0, %v1254_v39  ;;  %vm1258_vm6 = vcmp.lt.f32.partialorder %v1257_v40, 0.0004427343  ;;  %v1191_v51 = vmax.f32 %v2785_v22, 0.0  ;;  %v1178_v22 = vld [vmem:[%s2957_s8 + $0x10] sm:$0xff] }
 0x35b   : > { %v1260_v33 = vadd.f32 1.0, %v2788_v32  ;;  %v2791_v16 = vpop.eup %2136  ;;  %v1263_v58 = vmul.f32 -0.5, %v2788_v32  ;;  %v1247_v61 = vmul.f32 %v2131_v29, %v1246_v49  ;;  %v1266_v14 = vand.u32 2147483647, %v2788_v32 }
 0x35c   : > { %v1269_v2 = vadd.f32 1.0, %v2791_v16  ;;  %v1256_v7 = vmul.f32 %v2133_v11, %v1255_v54  ;;  %v1272_v39 = vmul.f32 -0.5, %v2791_v16  ;;  %v1275_v43 = vand.u32 2147483647, %v2791_v16 }
 0x35d   : > { %2148 = vlog2.f32 %v1260_v33  ;;  %v1264_v42 = vadd.f32 1.0, %v1263_v58  ;;  %vm1267_vm7 = vcmp.lt.f32.partialorder %v1266_v14, 0.0004427343  ;;  %v1179_v58 = vld [vmem:[%s2957_s8 + $0x18] sm:$0xff] }
 0x35e   : > { %v2793_v17 = vpop.eup %2138  ;;  %2150 = vpow2.f32 %v1222_v35  ;;  %v1190_v35 = vmax.f32 %v2782_v56, 0.0  ;;  %v1273_v28 = vadd.f32 1.0, %v1272_v39  ;;  %vm1276_vm9 = vcmp.lt.f32.partialorder %v1275_v43, 0.0004427343 }
 0x35f   : > { %v2141_v52 = vpop.eup %2140  ;;  %v1278_v44 = vadd.f32 1.0, %v2793_v17  ;;  %v1281_v57 = vmul.f32 -0.5, %v2793_v17  ;;  %v1284_v59 = vand.u32 2147483647, %v2793_v17  ;;  %v1265_v11 = vmul.f32 %v2788_v32, %v1264_v42 }
 0x360   : > { %v2143_v45 = vpop.eup %2142  ;;  %v1226_v47 = vmul.f32 0.6931472, %v2141_v52  ;;  %v1274_v1 = vmul.f32 %v2791_v16, %v1273_v28  ;;  %v1176_v16 = vld [vmem:[%s2957_s8] sm:$0xff] }
 0x361   : > { %v1235_v53 = vmul.f32 0.6931472, %v2143_v45  ;;  %2152 = vlog2.f32 %v1278_v44  ;;  %v1282_v26 = vadd.f32 1.0, %v1281_v57  ;;  %vm1285_vm8 = vcmp.lt.f32.partialorder %v1284_v59, 0.0004427343 }
 0x362   : > { %v1232_v0 = vsel %vm2801_vm3, %v1229_v9, %v1226_v47  ;;  %2154 = vlog2.f32 %v1269_v2 }
 0x363   : > { %v2145_v62 = vpop.eup %2144  ;;  %v1241_v5 = vsel %vm2805_vm4, %v1238_v60, %v1235_v53  ;;  %v1296_v20 = vadd.f32 %v1232_v0, %v1184_v18  ;;  %v1283_v33 = vmul.f32 %v2793_v17, %v1282_v26  ;;  %v1189_v53 = vmax.f32 %v2778_v41, 0.0  ;;  %v1177_v41 = vld [vmem:[%s2957_s8 + $0x8] sm:$0xff] }
 0x364   : > { %v2147_v46 = vpop.eup %2146  ;;  %v1244_v48 = vmul.f32 0.6931472, %v2145_v62  ;;  %v1297_v23 = vadd.f32 %v1241_v5, %v1185_v38  ;;  %v2256_v62 = vmov 0.0|0.0  }
 0x365   : > { %v1253_v6 = vmul.f32 0.6931472, %v2147_v46  ;;  %2007 = vmatprep.subr.bf16.mxu1 %v2256_v62 }
 0x366   : > { %v1250_v13 = vsel %vm1249_vm5, %v1247_v61, %v1244_v48  ;;  %v1312_v48 = vpop.permute.xlu1 %1311 }
 0x367   : > { %v2149_v19 = vpop.eup %2148  ;;  %v1298_v21 = vadd.f32 %v1250_v13, %v1186_v37  ;;  %v1259_v3 = vsel %vm1258_vm6, %v1256_v7, %v1253_v6 }
 0x368   : > { %v1299_v24 = vadd.f32 %v1259_v3, %v1187_v55  ;;  %v1262_v25 = vmul.f32 0.6931472, %v2149_v19  ;;  %v2151_v29 = vpop.eup %2150  ;;  %v1317_v19 = vpop.permute.xlu0 %1316 }
 0x369   : > { %v2001_v27 = vpack.c.bf16 %v1298_v21, %v1296_v20  ;;  %v1287_v8 = vadd.f32 1.0, %v2151_v29  ;;  %v1290_v38 = vmul.f32 -0.5, %v2151_v29  ;;  %v1293_v45 = vand.u32 2147483647, %v2151_v29 }
 0x36a   : > { %v1999_v4 = vpack.c.bf16 %v1299_v24, %v1297_v23  ;;  %v1268_v12 = vsel %vm1267_vm7, %v1265_v11, %v1262_v25  ;;  %v1322_v11 = vpop.permute.xlu1 %1321 }
 0x36b   : > { %v2153_v30 = vpop.eup %2152  ;;  %2156 = vlog2.f32 %v1287_v8  ;;  %v1300_v32 = vadd.f32 %v1268_v12, %v1188_v34  ;;  %v1291_v44 = vadd.f32 1.0, %v1290_v38  ;;  %vm1294_vm11 = vcmp.lt.f32.partialorder %v1293_v45, 0.0004427343 }
 0x36c   : > { %v1280_v15 = vmul.f32 0.6931472, %v2153_v30  ;;  %2000 = vmatprep.subr.bf16.mxu0 %v1999_v4  ;;  %v2155_v52 = vpop.eup %2154 }
 0x36d   : > { %2002 = vmatpush1.bf16.msra.mxu0 %v2001_v27  ;;  %v1271_v17 = vmul.f32 0.6931472, %v2155_v52  ;;  %v1292_v49 = vmul.f32 %v2151_v29, %v1291_v44 }
 0x36e   : > { %v1286_v18 = vsel %vm1285_vm8, %v1283_v33, %v1280_v15 }
 0x36f   : > { %v1302_v31 = vadd.f32 %v1286_v18, %v1190_v35  ;;  %v1277_v47 = vsel %vm1276_vm9, %v1274_v1, %v1271_v17 }
 0x370   : > { %v1301_v9 = vadd.f32 %v1277_v47, %v1189_v53 }
 0x371   : > { %v2005_v10 = vpack.c.bf16 %v1302_v31, %v1300_v32 }
 0x375   : > { %v2157_v56 = vpop.eup %2156 }
 0x376   : > { %v1289_v37 = vmul.f32 0.6931472, %v2157_v56 }
 0x378   : > { %v1295_v54 = vsel %vm1294_vm11, %v1292_v49, %v1289_v37 }
 0x379   : > { %v1303_v55 = vadd.f32 %v1295_v54, %v1191_v51 }
 0x37b   : > { %v2003_v40 = vpack.c.bf16 %v1303_v55, %v1301_v9 }
 0x37d   : > { %2004 = vmatprep.subr.bf16.mxu0 %v2003_v40 }
 0x37e   : > { %2006 = vmatpush1.bf16.msra.mxu0 %v2005_v10 }
 0x381   : > { %1747 = vmatmul.mubr.msk.f32.vlgmr.msra.gmra.mrb[8].mxu0 %vm825_vm10, %v1176_v16 }
 0x382   : > { %1406 = vmatprep.mubr.f32.mxu0 %v2255_v50 }
 0x385   : > { %1748 = vmatmul.mubr.msk.f32.gmra.mrb[10].mxu0 %vm825_vm10, %v1177_v41 }
 0x386   : > { %1412 = vmatprep.mubr.f32.mxu0 %v2255_v50 }
 0x389   : > { %1749 = vmatmul.mubr.msk.f32.gmra.mrb[12].mxu0 %vm825_vm10, %v1178_v22 }
 0x38a   : > { %1418 = vmatprep.mubr.f32.mxu0 %v2255_v50 }
 0x38d   : > { %1750 = vmatmul.mubr.msk.f32.gmra.mrb[14].mxu0 %vm825_vm10, %v1179_v58 }
 0x454   : > { %v1402_v60 = vpop.f32.mrb[8].mxu0 }
 0x455   : > { %v2847_v36 = vadd.f32 %v1402_v60, %v1307_v63  ;;  %v1404_v2 = vpop.f32.mrb[9].mxu0 }
 0x456   : > { %v2849_v46 = vadd.f32 %v1404_v2, %v1307_v63 }
 0x457   : > { %v1433_v0 = vand.u32 2147483647, %v2847_v36  ;;  %v1425_v58 = vmax.f32 %v2847_v36, 0.0 }
 0x458   : > { %v1434_v61 = vand.u32 2147483647, %v2849_v46  ;;  %v1408_v57 = vpop.f32.mrb[10].mxu0  ;;  %v1426_v2 = vmax.f32 %v2849_v46, 0.0 }
 0x459   : > { %v1441_v5 = vsub.f32 0.0, %v1433_v0  ;;  %v2853_v6 = vadd.f32 %v1408_v57, %v1312_v48  ;;  %v1410_v7 = vpop.f32.mrb[11].mxu0 }
 0x45a   : > { %v1442_v13 = vsub.f32 0.0, %v1434_v61  ;;  %v2855_v42 = vadd.f32 %v1410_v7, %v1312_v48 }
 0x45b   : > { %v1449_v50 = vmul.f32 1.442695, %v1441_v5  ;;  %v1435_v14 = vand.u32 2147483647, %v2853_v6  ;;  %v1427_v48 = vmax.f32 %v2853_v6, 0.0 }
 0x45c   : > { %v1451_v20 = vmul.f32 1.442695, %v1442_v13  ;;  %v1436_v21 = vand.u32 2147483647, %v2855_v42  ;;  %v1414_v3 = vpop.f32.mrb[12].mxu0 }
 0x45d   : > { %2158 = vpow2.f32 %v1449_v50  ;;  %v1443_v23 = vsub.f32 0.0, %v1435_v14  ;;  %v2859_v24 = vadd.f32 %v1414_v3, %v1317_v19  ;;  %v1416_v25 = vpop.f32.mrb[13].mxu0 }
 0x45e   : > { %2160 = vpow2.f32 %v1451_v20  ;;  %v1444_v26 = vsub.f32 0.0, %v1436_v21  ;;  %v2861_v27 = vadd.f32 %v1416_v25, %v1317_v19 }
 0x45f   : > { %v1453_v59 = vmul.f32 1.442695, %v1443_v23  ;;  %v1437_v29 = vand.u32 2147483647, %v2859_v24  ;;  %v1428_v23 = vmax.f32 %v2855_v42, 0.0 }
 0x460   : > { %v1455_v4 = vmul.f32 1.442695, %v1444_v26  ;;  %v1438_v30 = vand.u32 2147483647, %v2861_v27  ;;  %v1420_v8 = vpop.f32.mrb[14].mxu0 }
 0x461   : > { %2162 = vpow2.f32 %v1453_v59  ;;  %v1445_v12 = vsub.f32 0.0, %v1437_v29  ;;  %v2865_v15 = vadd.f32 %v1420_v8, %v1322_v11  ;;  %v1422_v33 = vpop.f32.mrb[15].mxu0 }
 0x462   : > { %2164 = vpow2.f32 %v1455_v4  ;;  %v1446_v34 = vsub.f32 0.0, %v1438_v30  ;;  %v2868_v31 = vadd.f32 %v1422_v33, %v1322_v11 }
 0x463   : > { %v1457_v35 = vmul.f32 1.442695, %v1445_v12  ;;  %v1439_v39 = vand.u32 2147483647, %v2865_v15  ;;  %v1431_v5 = vmax.f32 %v2865_v15, 0.0 }
 0x464   : > { %v1459_v18 = vmul.f32 1.442695, %v1446_v34  ;;  %v1440_v17 = vand.u32 2147483647, %v2868_v31 }
 0x465   : > { %2166 = vpow2.f32 %v1457_v35  ;;  %v1447_v32 = vsub.f32 0.0, %v1439_v39 }
 0x466   : > { %2168 = vpow2.f32 %v1459_v18  ;;  %v1448_v49 = vsub.f32 0.0, %v1440_v17 }
 0x467   : > { %v2159_v38 = vpop.eup %2158  ;;  %v1461_v52 = vmul.f32 1.442695, %v1447_v32 }
 0x468   : > { %v2161_v10 = vpop.eup %2160  ;;  %v1465_v28 = vadd.f32 1.0, %v2159_v38  ;;  %v1468_v1 = vmul.f32 -0.5, %v2159_v38  ;;  %v1471_v9 = vand.u32 2147483647, %v2159_v38  ;;  %v1463_v22 = vmul.f32 1.442695, %v1448_v49 }
 0x469   : > { %v1474_v43 = vadd.f32 1.0, %v2161_v10  ;;  %2170 = vpow2.f32 %v1461_v52  ;;  %v1477_v47 = vmul.f32 -0.5, %v2161_v10  ;;  %v1480_v0 = vand.u32 2147483647, %v2161_v10 }
 0x46a   : > { %2172 = vlog2.f32 %v1465_v28  ;;  %v1469_v54 = vadd.f32 1.0, %v1468_v1  ;;  %vm2879_vm13 = vcmp.lt.f32.partialorder %v1471_v9, 0.0004427343  ;;  %v1429_v1 = vmax.f32 %v2859_v24, 0.0 }
 0x46b   : > { %v2163_v44 = vpop.eup %2162  ;;  %2174 = vlog2.f32 %v1474_v43  ;;  %v1478_v16 = vadd.f32 1.0, %v1477_v47  ;;  %vm1481_vm14 = vcmp.lt.f32.partialorder %v1480_v0, 0.0004427343 }
 0x46c   : > { %v2165_v45 = vpop.eup %2164  ;;  %v1483_v56 = vadd.f32 1.0, %v2163_v44  ;;  %v1486_v55 = vmul.f32 -0.5, %v2163_v44  ;;  %v1470_v57 = vmul.f32 %v2159_v38, %v1469_v54  ;;  %v1489_v13 = vand.u32 2147483647, %v2163_v44 }
 0x46d   : > { %v1492_v37 = vadd.f32 1.0, %v2165_v45  ;;  %v1495_v63 = vmul.f32 -0.5, %v2165_v45  ;;  %v1479_v14 = vmul.f32 %v2161_v10, %v1478_v16  ;;  %v1498_v25 = vand.u32 2147483647, %v2165_v45 }
 0x46e   : > { %2176 = vlog2.f32 %v1483_v56  ;;  %v1487_v7 = vadd.f32 1.0, %v1486_v55  ;;  %vm1490_vm15 = vcmp.lt.f32.partialorder %v1489_v13, 0.0004427343  ;;  %v1430_v54 = vmax.f32 %v2861_v27, 0.0 }
 0x46f   : > { %v2167_v53 = vpop.eup %2166  ;;  %2178 = vlog2.f32 %v1492_v37  ;;  %v1496_v21 = vadd.f32 1.0, %v1495_v63  ;;  %vm1499_vm0 = vcmp.lt.f32.partialorder %v1498_v25, 0.0004427343 }
 0x470   : > { %v2871_v51 = vpop.eup %2168  ;;  %v1501_v40 = vadd.f32 1.0, %v2167_v53  ;;  %v1504_v19 = vmul.f32 -0.5, %v2167_v53  ;;  %v1488_v11 = vmul.f32 %v2163_v44, %v1487_v7  ;;  %v1507_v33 = vand.u32 2147483647, %v2167_v53 }
 0x471   : > { %v1510_v41 = vadd.f32 1.0, %v2871_v51  ;;  %v1513_v46 = vmul.f32 -0.5, %v2871_v51  ;;  %v1497_v35 = vmul.f32 %v2165_v45, %v1496_v21  ;;  %v1516_v42 = vand.u32 2147483647, %v2871_v51 }
 0x472   : > { %2180 = vlog2.f32 %v1501_v40  ;;  %v1505_v12 = vadd.f32 1.0, %v1504_v19  ;;  %vm1508_vm1 = vcmp.lt.f32.partialorder %v1507_v33, 0.0004427343 }
 0x473   : > { %v2875_v60 = vpop.eup %2170  ;;  %2182 = vlog2.f32 %v1510_v41  ;;  %v1514_v39 = vadd.f32 1.0, %v1513_v46  ;;  %vm1517_vm2 = vcmp.lt.f32.partialorder %v1516_v42, 0.0004427343 }
 0x474   : > { %v2173_v61 = vpop.eup %2172  ;;  %2184 = vpow2.f32 %v1463_v22  ;;  %v1519_v6 = vadd.f32 1.0, %v2875_v60  ;;  %v1506_v44 = vmul.f32 %v2167_v53, %v1505_v12  ;;  %v1522_v41 = vmul.f32 -0.5, %v2875_v60 }
 0x475   : > { %v2175_v50 = vpop.eup %2174  ;;  %v1467_v36 = vmul.f32 0.6931472, %v2173_v61  ;;  %v1515_v45 = vmul.f32 %v2871_v51, %v1514_v39  ;;  %v1525_v63 = vand.u32 2147483647, %v2875_v60 }
 0x476   : > { %v1476_v20 = vmul.f32 0.6931472, %v2175_v50  ;;  %2186 = vlog2.f32 %v1519_v6  ;;  %v1523_v51 = vadd.f32 1.0, %v1522_v41 }
 0x477   : > { %v1473_v3 = vsel %vm2879_vm13, %v1470_v57, %v1467_v36  ;;  %vm1526_vm3 = vcmp.lt.f32.partialorder %v1525_v63, 0.0004427343 }
 0x478   : > { %v2177_v26 = vpop.eup %2176  ;;  %v1537_v59 = vadd.f32 %v1473_v3, %v1425_v58  ;;  %v1482_v29 = vsel %vm1481_vm14, %v1479_v14, %v1476_v20  ;;  %v1524_v27 = vmul.f32 %v2875_v60, %v1523_v51  ;;  %v1549_v60 = vld [vmem:[%s2959_s10] sm:$0x1] }
 0x479   : > { %v2179_v4 = vpop.eup %2178  ;;  %v1538_v30 = vadd.f32 %v1482_v29, %v1426_v2  ;;  %v1485_v8 = vmul.f32 0.6931472, %v2177_v26 }
 0x47a   : > { %v1494_v34 = vmul.f32 0.6931472, %v2179_v4 }
 0x47b   : > { %v1545_v18 = vsub.f32 %v1537_v59, %v1538_v30  ;;  %v1491_v32 = vsel %vm1490_vm15, %v1488_v11, %v1485_v8 }
 0x47c   : > { %v2181_v38 = vpop.eup %2180  ;;  %v1539_v52 = vadd.f32 %v1491_v32, %v1427_v48  ;;  %v1500_v10 = vsel %vm1499_vm0, %v1497_v35, %v1494_v34 }
 0x47d   : > { %v2183_v28 = vpop.eup %2182  ;;  %v1540_v43 = vadd.f32 %v1500_v10, %v1428_v23  ;;  %v1503_v17 = vmul.f32 0.6931472, %v2181_v38 }
 0x47e   : > { %v1512_v56 = vmul.f32 0.6931472, %v2183_v28  ;;  %v2185_v47 = vpop.eup %2184 }
 0x47f   : > { %v1546_v37 = vsub.f32 %v1539_v52, %v1540_v43  ;;  %v1509_v49 = vsel %vm1508_vm1, %v1506_v44, %v1503_v17  ;;  %v1528_v40 = vadd.f32 1.0, %v2185_v47  ;;  %v1531_v58 = vmul.f32 -0.5, %v2185_v47 }
 0x480   : > { %v1541_v9 = vadd.f32 %v1509_v49, %v1429_v1  ;;  %v1518_v55 = vsel %vm1517_vm2, %v1515_v45, %v1512_v56  ;;  %v2187_v24 = vpop.eup %2186  ;;  %v1534_v48 = vand.u32 2147483647, %v2185_v47 }
 0x481   : > { %v1542_v16 = vadd.f32 %v1518_v55, %v1430_v54  ;;  %v2008_v22 = vpack.c.bf16 %v1546_v37, %v1545_v18  ;;  %2188 = vlog2.f32 %v1528_v40  ;;  %v1521_v2 = vmul.f32 0.6931472, %v2187_v24 }
 0x482   : > { %v1532_v0 = vadd.f32 1.0, %v1531_v58  ;;  %vm1535_vm4 = vcmp.lt.f32.partialorder %v1534_v48, 0.0004427343 }
 0x483   : > { %v1547_v53 = vsub.f32 %v1541_v9, %v1542_v16  ;;  %2009 = vmatpush3.bf16.msra.mxu1 %v2008_v22  ;;  %v1527_v61 = vsel %vm1526_vm3, %v1524_v27, %v1521_v2 }
 0x484   : > { %2010 = vmatprep.subr.bf16.mxu1 %v2256_v62  ;;  %v1533_v13 = vmul.f32 %v2185_v47, %v1532_v0  ;;  %v1543_v50 = vadd.f32 %v1527_v61, %v1431_v5  ;;  %v1432_v62 = vmax.f32 %v2868_v31, 0.0 }
 0x48b   : > { %v2189_v57 = vpop.eup %2188 }
 0x48c   : > { %v1530_v7 = vmul.f32 0.6931472, %v2189_v57 }
 0x48e   : > { %v1536_v36 = vsel %vm1535_vm4, %v1533_v13, %v1530_v7 }
 0x48f   : > { %v1544_v14 = vadd.f32 %v1536_v36, %v1432_v62 }
 0x491   : > { %v1548_v19 = vsub.f32 %v1543_v50, %v1544_v14 }
 0x493   : > { %v2011_v20 = vpack.c.bf16 %v1548_v19, %v1547_v53 }
 0x495   : > { %2012 = vmatpush3.bf16.msra.mxu1 %v2011_v20 }
 0x498   : > { %1885 = vmatmul.mubr.msk.f32.vlgmr.msra.gmra.mrb[16].mxu1 %vm825_vm10, %v1549_v60 }
 0x56b   : > { %v1619_v15 = vpop.f32.mrb[16].mxu1 }
 0x56c   : > { %v1623_v21 = vmul.f32 4.0, %v1619_v15  ;;  %v1886_v46 = vpop.f32.mrb[17].mxu1 }
 0x56e   : > { %1624 = vst [vmem:[%s379_s22] sm:$0x1] %v1623_v21 }
 0x56f   : > { %2203 = shalt.err (!%p2200_p3)
}
 0x570   : > { %s2204_s29 = scalar_lea.hbm %s2907_s12, 16  ;;  %s2208_s22 = scalar_lea.hbm %s2960_s11, 32 }
 0x571   : > { %p2205_p4 = scmp.ne.s32.totalorder %s2907_s12, %s2204_s29  ;;  %p2209_p9 = scmp.lt.u32.totalorder %s2907_s12, %s2960_s11 }
 0x572   : > { %p2210_p10 = scmp.lt.u32.totalorder %s2208_s22, %s2204_s29  ;;  %p2212_p12 = scmp.lt.u32.totalorder %s2204_s29, %s2907_s12 }
 0x573   : > { %p2206_p7 = pnand %p2205_p4, %p2354_p5 }
 0x574   : > { %p2211_p11 = por %p2210_p10, %p2209_p9 }
 0x575   : > { %p2207_p8 = pneg %p2206_p7 }
 0x576   : > { %p2213_p13 = por %p2212_p12, %p2211_p11 }
 0x578   : > { %p2214_p0 = pnand %p2213_p13, %p2207_p8 }
 0x57a   : > { %2217 = shalt.err (!%p2214_p0)
}
 0x57b   : > { %2017 = dma.vmem_to_hbm [thread:$0]  (%p2354_p5), %s2909_s24, 16, %s2907_s12, %s1626_s13  }
 0x57c PF: > { %p2023_p1 = scmp.ge.s32.totalorder %s2252_s20, 2  ;;  %s1650_s14 = sand.u32 1, %s2240_s17  }
 0x57d   : > { %s1651_s19 = scalar_lea.sflag [#allocation3], %s1650_s14 }
 0x57e   : > { %p2020_p2 = pnand %p2023_p1, %p2358_p6 }
 0x580   : > { %2235 = dma.done.wait (!%p2020_p2), %s1651_s19, 16  }
 0x581   : > { %2237 = vsyncadd (!%p2020_p2), %s1651_s19, 4294967280  ;;  %s2994_s26 = sld [smem:[#allocation5_spill]]  ;;  %s2995_s19 = sld [smem:[#allocation6_spill]] }
 0x582   : > { %p21_p3 = scmp.ge.s32.totalorder %s2342_s23, 4   ;;  %s2996_s17 = smov %s2244_s18 }
 0x583   : > { %s2998_s20 = smov %s2342_s23 }
 0x584   :  { %23 = sbr.rel (!%p21_p3) target bundleno = 3 (0x3), region = 99 }
 0x587   : > { %s2997_s18 = smov %s2994_s26 }
 0x58b   :  { %1655 = vsyncpa [#allocation3], 1 }
 0x58c   :  { %1657 = vsyncpa [#allocation3 + $0x1], 1 }

</bundles_post_ra>
